<compile_context>
chip_gen: v7x
topology: tpu7x:2x2x1
jax: 0.10.0
libtpu: 0.0.40
codegen_flags: <defaults>
</compile_context>

<pallas_src>
import functools

import jax
import jax.numpy as jnp
from jax.experimental import pallas as pl
from jax.experimental.pallas import tpu as pltpu

HIDDEN = 10          # hidden_size = int(20 / 2)
IN1 = 10             # song_emb(8) + skip_emb(2)
IN2 = 2 * HIDDEN     # bidirectional layer-1 output width
VOCAB_SONG = 3706389
VOCAB_SKIP = 4


def _rnn_encoder_kernel(x_ref,
                        w_ih1, w_hh1, b1,
                        w_ih2f, w_ih2b, w_hh2, b2,
                        wlin_f, wlin_b, b_lin,
                        out_ref,
                        o1f, o1b, o2f, o2b,
                        *, seq_len, batch):
    T, B, H = seq_len, batch, HIDDEN
    H2, G8 = 2 * H, 8 * H

    # ---- lane-classification masks for the packed (., 8H) gate layout ----
    # column block k = 2*gate + dir   (gate order i, f, g, o ; dir 0=fwd, 1=bwd)
    # built once (hoisted out of both recurrences), no integer division.
    lane8 = jax.lax.broadcasted_iota(jnp.int32, (B, G8), 1)
    cell_mask = (lane8 >= 4 * H) & (lane8 < 6 * H)              # gate 'g' -> tanh
    fwd_mask8 = ((lane8 < H)
                 | ((lane8 >= 2 * H) & (lane8 < 3 * H))
                 | ((lane8 >= 4 * H) & (lane8 < 5 * H))
                 | ((lane8 >= 6 * H) & (lane8 < 7 * H)))        # even blocks = fwd dir

    def run_layer(xp, w_hh_ref, fwd_scr, bwd_scr):
        # xp: (T*B, 8H) precomputed input projections (+bias), packed layout.
        whh = w_hh_ref[...]                                     # (2H, 8H) block-sparse
        h_cat = jnp.zeros((B, H2), jnp.float32)                 # [fwd | bwd] hidden
        c_cat = jnp.zeros((B, H2), jnp.float32)

        # Fully unrolled (T static & tiny); h/c live in vregs.  One MXU push,
        # ~4 EUP pushes and 2 full-width stores per step; the fwd and bwd
        # chains share the single packed matmul.
        for s in range(T):
            tf, tb = s, T - 1 - s
            # fwd-gate lanes take time tf's projection, bwd-gate lanes take tb's
            x_sel = jnp.where(fwd_mask8,
                              xp[tf * B:(tf + 1) * B, :],
                              xp[tb * B:(tb + 1) * B, :])        # (B, 8H)
            pre = x_sel + jnp.dot(h_cat, whh,
                                  preferred_element_type=jnp.float32)
            # one sigmoid + one tanh over the whole packed vreg, lane-selected
            act = jnp.where(cell_mask, jnp.tanh(pre), jax.nn.sigmoid(pre))
            i_cat = act[:, 0 * H2:1 * H2]                        # [i_f | i_b]
            f_cat = act[:, 1 * H2:2 * H2]
            g_cat = act[:, 2 * H2:3 * H2]
            o_cat = act[:, 3 * H2:4 * H2]
            c_cat = f_cat * c_cat + i_cat * g_cat
            h_cat = o_cat * jnp.tanh(c_cat)
            fwd_scr[tf * B:(tf + 1) * B, :] = h_cat[:, :H]
            bwd_scr[tb * B:(tb + 1) * B, :] = h_cat[:, H:]

    # ---- layer 1: ONE packed input-projection matmul for all T/gates/dirs ----
    xp1 = jnp.dot(x_ref[...], w_ih1[...],
                  preferred_element_type=jnp.float32) + b1[...]      # (T*B, 8H)
    run_layer(xp1, w_hh1, o1f, o1b)

    # ---- layer 2: two packed projections (one per layer-1 half) ----
    xp2 = (jnp.dot(o1f[...], w_ih2f[...], preferred_element_type=jnp.float32)
           + jnp.dot(o1b[...], w_ih2b[...], preferred_element_type=jnp.float32)
           + b2[...])                                                 # (T*B, 8H)
    run_layer(xp2, w_hh2, o2f, o2b)

    # ---- Linear(2H -> 1) + sigmoid ----
    zf = jnp.sum(o2f[...] * wlin_f[...], axis=-1, keepdims=True)      # (T*B, 1)
    zb = jnp.sum(o2b[...] * wlin_b[...], axis=-1, keepdims=True)
    out_ref[...] = jax.nn.sigmoid(zf + zb + b_lin[...])


def rnn_encoder_pallas(params, x_song, x_skip, x_mask):
    del x_mask  # TODO(synk): pack_padded path not implemented (unpadded BRNN semantics)
    B, T = x_song.shape
    song_vec = jnp.take(params['song_emb'], x_song, axis=0)            # (B, T, 8)
    skip_vec = jnp.take(params['skip_emb'], x_skip, axis=0)            # (B, T, 2)
    rnn_in = jnp.concatenate([song_vec, skip_vec], axis=-1)            # (B, T, 10)
    # time-major, flattened to (T*B, IN1); row t*B+b <-> (time t, batch b)
    x_flat = jnp.transpose(rnn_in, (1, 0, 2)).reshape(T * B, IN1).astype(jnp.float32)

    args = [x_flat,
            params['w_ih1_p'], params['w_hh1_p'], params['b1_p'],
            params['w_ih2f_p'], params['w_ih2b_p'], params['w_hh2_p'], params['b2_p'],
            params['wlin_f'], params['wlin_b'], params['b_lin']]
    vmem = pl.BlockSpec(memory_space=pltpu.MemorySpace.VMEM)

    out_flat = pl.pallas_call(
        functools.partial(_rnn_encoder_kernel, seq_len=T, batch=B),
        out_shape=jax.ShapeDtypeStruct((T * B, 1), jnp.float32),
        in_specs=[vmem] * len(args),
        out_specs=vmem,
        scratch_shapes=[
            pltpu.VMEM((T * B, HIDDEN), jnp.float32),   # layer-1 fwd outputs
            pltpu.VMEM((T * B, HIDDEN), jnp.float32),   # layer-1 bwd outputs
            pltpu.VMEM((T * B, HIDDEN), jnp.float32),   # layer-2 fwd outputs
            pltpu.VMEM((T * B, HIDDEN), jnp.float32),   # layer-2 bwd outputs
        ],
    )(*args)

    return out_flat.reshape(T, B).T                                    # (B, T)


# ----------------------- parameter init (deterministic) -----------------------
def _pack_layer_params(w_ih, w_hh, b):
    """Pack (2,4,Din,H)/(2,4,H,H)/(2,4,1,H) into lane-packed kernel weights.

    Column block index = 2*gate + dir (gate-major, direction-minor).  W_hh is
    block-structured on a (2H, 8H) canvas: fwd hidden rows feed only fwd-gate
    columns, bwd hidden rows feed only bwd-gate columns.
    """
    H = HIDDEN
    ih_cols, hh_cols, b_cols = [], [], []
    for g in range(4):                  # gate order i, f, g, o
        for d in range(2):              # 0 = fwd, 1 = bwd
            ih_cols.append(w_ih[d, g])                                  # (Din, H)
            blk = jnp.zeros((2 * H, H), jnp.float32)
            blk = blk.at[d * H:(d + 1) * H, :].set(w_hh[d, g])
            hh_cols.append(blk)
            b_cols.append(b[d, g])                                      # (1, H)
    return (jnp.concatenate(ih_cols, axis=-1),      # (Din, 8H)
            jnp.concatenate(hh_cols, axis=-1),      # (2H, 8H)
            jnp.concatenate(b_cols, axis=-1))       # (1, 8H)


def init_params(key):
    ks = list(jax.random.split(key, 32))
    kit = iter(ks)

    def uni(shape, bound):
        return jax.random.uniform(next(kit), shape, jnp.float32, -bound, bound)

    params = {}
    song = jax.random.normal(next(kit), (VOCAB_SONG, 8), jnp.float32)
    params['song_emb'] = song.at[0].set(0.0)                       # padding_idx=0
    skip = jax.random.normal(next(kit), (VOCAB_SKIP, 2), jnp.float32)
    params['skip_emb'] = skip.at[0].set(0.0)                       # padding_idx=0

    H = HIDDEN
    bound = 1.0 / (H ** 0.5)

    def make_layer(din):
        # torch-layout weights -> per-direction, per-gate reference layout
        w_ih, w_hh, b = [], [], []
        for _ in range(2):                                         # fwd, bwd
            wi = uni((4 * H, din), bound)                          # (4H, Din)
            wh = uni((4 * H, H), bound)                            # (4H, H)
            bi = uni((4 * H,), bound)
            bh = uni((4 * H,), bound)
            w_ih.append(jnp.transpose(wi.reshape(4, H, din), (0, 2, 1)))  # (4, Din, H)
            w_hh.append(jnp.transpose(wh.reshape(4, H, H), (0, 2, 1)))    # (4, H, H)
            b.append((bi + bh).reshape(4, 1, H))                          # (4, 1, H)
        return jnp.stack(w_ih), jnp.stack(w_hh), jnp.stack(b)      # leading dir axis

    w_ih1, w_hh1, b1 = make_layer(IN1)
    w_ih2, w_hh2, b2 = make_layer(IN2)
    params['w_ih1'], params['w_hh1'], params['b1'] = w_ih1, w_hh1, b1
    params['w_ih2'], params['w_hh2'], params['b2'] = w_ih2, w_hh2, b2

    # packed kernel weights
    p_ih1, p_hh1, p_b1 = _pack_layer_params(w_ih1, w_hh1, b1)
    p_ih2, p_hh2, p_b2 = _pack_layer_params(w_ih2, w_hh2, b2)
    params['w_ih1_p'], params['w_hh1_p'], params['b1_p'] = p_ih1, p_hh1, p_b1
    params['w_ih2f_p'] = p_ih2[:H]        # rows multiplying layer-1 fwd half
    params['w_ih2b_p'] = p_ih2[H:]        # rows multiplying layer-1 bwd half
    params['w_hh2_p'], params['b2_p'] = p_hh2, p_b2

    lin_bound = 1.0 / (IN2 ** 0.5)
    w_lin = uni((1, IN2), lin_bound)                               # torch Linear(20,1)
    b_lin = uni((1,), lin_bound)
    params['w_lin'] = w_lin
    params['b_lin'] = b_lin.reshape(1, 1)
    params['wlin_f'] = w_lin[:, :H]                                # (1, H)
    params['wlin_b'] = w_lin[:, H:]                                # (1, H)
    return params


# ----------------------- pure-JAX reference (for sanity) -----------------------
def _lstm_ref(x, w_ih, w_hh, b, d, reverse):
    # x: (T, B, Din); w_ih: (2,4,Din,H); w_hh: (2,4,H,H); b: (2,4,1,H)
    T, B, _ = x.shape
    H = HIDDEN
    hi = jax.lax.Precision.HIGHEST
    h = jnp.zeros((B, H), jnp.float32)
    c = jnp.zeros((B, H), jnp.float32)
    outs = [None] * T
    order = range(T - 1, -1, -1) if reverse else range(T)
    for t in order:
        pre = [(b[d, g] + jnp.dot(x[t], w_ih[d, g], precision=hi))
               + jnp.dot(h, w_hh[d, g], precision=hi) for g in range(4)]
        i = jax.nn.sigmoid(pre[0])
        f = jax.nn.sigmoid(pre[1])
        g_ = jnp.tanh(pre[2])
        o = jax.nn.sigmoid(pre[3])
        c = f * c + i * g_
        h = o * jnp.tanh(c)
        outs[t] = h
    return jnp.stack(outs, axis=0)                                 # (T, B, H)


def rnn_encoder_ref(params, x_song, x_skip, x_mask):
    del x_mask
    song_vec = jnp.take(params['song_emb'], x_song, axis=0)
    skip_vec = jnp.take(params['skip_emb'], x_skip, axis=0)
    x = jnp.transpose(jnp.concatenate([song_vec, skip_vec], axis=-1),
                      (1, 0, 2)).astype(jnp.float32)               # (T, B, 10)
    o1 = jnp.concatenate(
        [_lstm_ref(x, params['w_ih1'], params['w_hh1'], params['b1'], 0, False),
         _lstm_ref(x, params['w_ih1'], params['w_hh1'], params['b1'], 1, True)], axis=-1)
    o2 = jnp.concatenate(
        [_lstm_ref(o1, params['w_ih2'], params['w_hh2'], params['b2'], 0, False),
         _lstm_ref(o1, params['w_ih2'], params['w_hh2'], params['b2'], 1, True)], axis=-1)
    z = jnp.sum(o2 * params['w_lin'].reshape(1, 1, IN2), axis=-1) + params['b_lin']
    return jax.nn.sigmoid(z).T                                     # (B, T)


if __name__ == "__main__":
    key = jax.random.PRNGKey(0)
    pkey, k1, k2 = jax.random.split(key, 3)
    params = init_params(pkey)

    B, T = 2, 8
    x_song = jax.random.randint(k1, (B, T), 1, VOCAB_SONG, dtype=jnp.int32)
    x_skip = jax.random.randint(k2, (B, T), 1, VOCAB_SKIP, dtype=jnp.int32)
    x_mask = jnp.zeros((B, T), jnp.int32)   # no padding -> unpadded BRNN path

    logits = jax.jit(rnn_encoder_pallas)(params, x_song, x_skip, x_mask)
    logits = jax.block_until_ready(logits)
    assert logits.shape == (B, T), logits.shape

    ref = jax.block_until_ready(jax.jit(rnn_encoder_ref)(params, x_song, x_skip, x_mask))
    max_err = float(jnp.max(jnp.abs(logits - ref)))
    assert max_err < 1e-5, max_err

    print("KERNEL_OK")
</pallas_src>

<mosaic_0001>
module attributes {stable_mosaic.version = 11 : i64} {
  func.func @_rnn_encoder_kernel(%arg0: memref<16x10xf32, #tpu.memory_space<vmem>>, %arg1: memref<10x80xf32, #tpu.memory_space<vmem>>, %arg2: memref<20x80xf32, #tpu.memory_space<vmem>>, %arg3: memref<1x80xf32, #tpu.memory_space<vmem>>, %arg4: memref<10x80xf32, #tpu.memory_space<vmem>>, %arg5: memref<10x80xf32, #tpu.memory_space<vmem>>, %arg6: memref<20x80xf32, #tpu.memory_space<vmem>>, %arg7: memref<1x80xf32, #tpu.memory_space<vmem>>, %arg8: memref<1x10xf32, #tpu.memory_space<vmem>>, %arg9: memref<1x10xf32, #tpu.memory_space<vmem>>, %arg10: memref<1x1xf32, #tpu.memory_space<vmem>>, %arg11: memref<16x1xf32, #tpu.memory_space<vmem>>, %arg12: memref<16x10xf32, #tpu.memory_space<vmem>>, %arg13: memref<16x10xf32, #tpu.memory_space<vmem>>, %arg14: memref<16x10xf32, #tpu.memory_space<vmem>>, %arg15: memref<16x10xf32, #tpu.memory_space<vmem>>) attributes {dimension_semantics = [], scalar_prefetch = 0 : i64, scratch_operands = 4 : i64, tpu.core_type = #tpu.core_type<tc>} {
    %0 = tpu.iota {dimensions = array<i32: 1>} : vector<2x80xi32>
    %c40_i32 = arith.constant 40 : i32
    %1 = vector.broadcast %c40_i32 : i32 to vector<2x80xi32>
    %2 = arith.cmpi sge, %0, %1 : vector<2x80xi32>
    %c60_i32 = arith.constant 60 : i32
    %3 = vector.broadcast %c60_i32 : i32 to vector<2x80xi32>
    %4 = arith.cmpi slt, %0, %3 : vector<2x80xi32>
    %5 = arith.andi %2, %4 : vector<2x80xi1>
    %c10_i32 = arith.constant 10 : i32
    %6 = vector.broadcast %c10_i32 : i32 to vector<2x80xi32>
    %7 = arith.cmpi slt, %0, %6 : vector<2x80xi32>
    %c20_i32 = arith.constant 20 : i32
    %8 = vector.broadcast %c20_i32 : i32 to vector<2x80xi32>
    %9 = arith.cmpi sge, %0, %8 : vector<2x80xi32>
    %c30_i32 = arith.constant 30 : i32
    %10 = vector.broadcast %c30_i32 : i32 to vector<2x80xi32>
    %11 = arith.cmpi slt, %0, %10 : vector<2x80xi32>
    %12 = arith.andi %9, %11 : vector<2x80xi1>
    %13 = arith.ori %7, %12 : vector<2x80xi1>
    %c40_i32_0 = arith.constant 40 : i32
    %14 = vector.broadcast %c40_i32_0 : i32 to vector<2x80xi32>
    %15 = arith.cmpi sge, %0, %14 : vector<2x80xi32>
    %c50_i32 = arith.constant 50 : i32
    %16 = vector.broadcast %c50_i32 : i32 to vector<2x80xi32>
    %17 = arith.cmpi slt, %0, %16 : vector<2x80xi32>
    %18 = arith.andi %15, %17 : vector<2x80xi1>
    %19 = arith.ori %13, %18 : vector<2x80xi1>
    %c60_i32_1 = arith.constant 60 : i32
    %20 = vector.broadcast %c60_i32_1 : i32 to vector<2x80xi32>
    %21 = arith.cmpi sge, %0, %20 : vector<2x80xi32>
    %c70_i32 = arith.constant 70 : i32
    %22 = vector.broadcast %c70_i32 : i32 to vector<2x80xi32>
    %23 = arith.cmpi slt, %0, %22 : vector<2x80xi32>
    %24 = arith.andi %21, %23 : vector<2x80xi1>
    %25 = arith.ori %19, %24 : vector<2x80xi1>
    %c0 = arith.constant 0 : index
    %c0_2 = arith.constant 0 : index
    %26 = vector.load %arg0[%c0, %c0_2] : memref<16x10xf32, #tpu.memory_space<vmem>>, vector<16x10xf32>
    %c0_3 = arith.constant 0 : index
    %c0_4 = arith.constant 0 : index
    %27 = vector.load %arg1[%c0_3, %c0_4] : memref<10x80xf32, #tpu.memory_space<vmem>>, vector<10x80xf32>
    %cst = arith.constant dense<0.000000e+00> : vector<16x80xf32>
    %28 = tpu.matmul %26, %27, %cst {dimension_numbers = #tpu.dot_dimension_numbers<[1], [0], [0], [1], [0, 0, 1, 1], [], []>} : vector<16x10xf32>, vector<10x80xf32>, vector<16x80xf32> -> vector<16x80xf32>
    %c0_5 = arith.constant 0 : index
    %c0_6 = arith.constant 0 : index
    %29 = vector.load %arg3[%c0_5, %c0_6] : memref<1x80xf32, #tpu.memory_space<vmem>>, vector<1x80xf32>
    %30 = vector.broadcast %29 : vector<1x80xf32> to vector<16x80xf32>
    %31 = arith.addf %28, %30 : vector<16x80xf32>
    %c0_7 = arith.constant 0 : index
    %c0_8 = arith.constant 0 : index
    %32 = vector.load %arg2[%c0_7, %c0_8] : memref<20x80xf32, #tpu.memory_space<vmem>>, vector<20x80xf32>
    %cst_9 = arith.constant 0.000000e+00 : f32
    %33 = vector.broadcast %cst_9 : f32 to vector<2x20xf32>
    %cst_10 = arith.constant 0.000000e+00 : f32
    %34 = vector.broadcast %cst_10 : f32 to vector<2x20xf32>
    %35 = vector.extract_strided_slice %31 {offsets = [0, 0], sizes = [2, 80], strides = [1, 1]} : vector<16x80xf32> to vector<2x80xf32>
    %36 = vector.extract_strided_slice %31 {offsets = [14, 0], sizes = [2, 80], strides = [1, 1]} : vector<16x80xf32> to vector<2x80xf32>
    %37 = arith.select %25, %35, %36 : vector<2x80xi1>, vector<2x80xf32>
    %cst_11 = arith.constant dense<0.000000e+00> : vector<2x80xf32>
    %38 = tpu.matmul %33, %32, %cst_11 {dimension_numbers = #tpu.dot_dimension_numbers<[1], [0], [0], [1], [0, 0, 1, 1], [], []>} : vector<2x20xf32>, vector<20x80xf32>, vector<2x80xf32> -> vector<2x80xf32>
    %39 = arith.addf %37, %38 : vector<2x80xf32>
    %40 = math.tanh %39 : vector<2x80xf32>
    %41 = arith.negf %39 : vector<2x80xf32>
    %42 = math.exp %41 : vector<2x80xf32>
    %cst_12 = arith.constant 1.000000e+00 : f32
    %43 = vector.broadcast %cst_12 : f32 to vector<2x80xf32>
    %44 = arith.addf %43, %42 : vector<2x80xf32>
    %45 = arith.divf %43, %44 : vector<2x80xf32>
    %46 = arith.select %5, %40, %45 : vector<2x80xi1>, vector<2x80xf32>
    %47 = vector.extract_strided_slice %46 {offsets = [0, 0], sizes = [2, 20], strides = [1, 1]} : vector<2x80xf32> to vector<2x20xf32>
    %48 = vector.extract_strided_slice %46 {offsets = [0, 20], sizes = [2, 20], strides = [1, 1]} : vector<2x80xf32> to vector<2x20xf32>
    %49 = vector.extract_strided_slice %46 {offsets = [0, 40], sizes = [2, 20], strides = [1, 1]} : vector<2x80xf32> to vector<2x20xf32>
    %50 = vector.extract_strided_slice %46 {offsets = [0, 60], sizes = [2, 20], strides = [1, 1]} : vector<2x80xf32> to vector<2x20xf32>
    %51 = arith.mulf %48, %34 : vector<2x20xf32>
    %52 = arith.mulf %47, %49 : vector<2x20xf32>
    %53 = arith.addf %51, %52 : vector<2x20xf32>
    %54 = math.tanh %53 : vector<2x20xf32>
    %55 = arith.mulf %50, %54 : vector<2x20xf32>
    %56 = vector.extract_strided_slice %55 {offsets = [0, 0], sizes = [2, 10], strides = [1, 1]} : vector<2x20xf32> to vector<2x10xf32>
    %c0_13 = arith.constant 0 : index
    %c0_14 = arith.constant 0 : index
    %57 = vector.load %arg12[%c0_13, %c0_14] : memref<16x10xf32, #tpu.memory_space<vmem>>, vector<2x10xf32>
    tpu.vector_store %arg12[%c0_13, %c0_14], %56 {strides = array<i32>} : memref<16x10xf32, #tpu.memory_space<vmem>>, vector<2x10xf32>,
    %58 = vector.extract_strided_slice %55 {offsets = [0, 10], sizes = [2, 10], strides = [1, 1]} : vector<2x20xf32> to vector<2x10xf32>
    %c14 = arith.constant 14 : index
    %c0_15 = arith.constant 0 : index
    %59 = vector.load %arg13[%c14, %c0_15] : memref<16x10xf32, #tpu.memory_space<vmem>>, vector<2x10xf32>
    tpu.vector_store %arg13[%c14, %c0_15], %58 {strides = array<i32>} : memref<16x10xf32, #tpu.memory_space<vmem>>, vector<2x10xf32>,
    %60 = vector.extract_strided_slice %31 {offsets = [2, 0], sizes = [2, 80], strides = [1, 1]} : vector<16x80xf32> to vector<2x80xf32>
    %61 = vector.extract_strided_slice %31 {offsets = [12, 0], sizes = [2, 80], strides = [1, 1]} : vector<16x80xf32> to vector<2x80xf32>
    %62 = arith.select %25, %60, %61 : vector<2x80xi1>, vector<2x80xf32>
    %cst_16 = arith.constant dense<0.000000e+00> : vector<2x80xf32>
    %63 = tpu.matmul %55, %32, %cst_16 {dimension_numbers = #tpu.dot_dimension_numbers<[1], [0], [0], [1], [0, 0, 1, 1], [], []>} : vector<2x20xf32>, vector<20x80xf32>, vector<2x80xf32> -> vector<2x80xf32>
    %64 = arith.addf %62, %63 : vector<2x80xf32>
    %65 = math.tanh %64 : vector<2x80xf32>
    %66 = arith.negf %64 : vector<2x80xf32>
    %67 = math.exp %66 : vector<2x80xf32>
    %cst_17 = arith.constant 1.000000e+00 : f32
    %68 = vector.broadcast %cst_17 : f32 to vector<2x80xf32>
    %69 = arith.addf %68, %67 : vector<2x80xf32>
    %70 = arith.divf %68, %69 : vector<2x80xf32>
    %71 = arith.select %5, %65, %70 : vector<2x80xi1>, vector<2x80xf32>
    %72 = vector.extract_strided_slice %71 {offsets = [0, 0], sizes = [2, 20], strides = [1, 1]} : vector<2x80xf32> to vector<2x20xf32>
    %73 = vector.extract_strided_slice %71 {offsets = [0, 20], sizes = [2, 20], strides = [1, 1]} : vector<2x80xf32> to vector<2x20xf32>
    %74 = vector.extract_strided_slice %71 {offsets = [0, 40], sizes = [2, 20], strides = [1, 1]} : vector<2x80xf32> to vector<2x20xf32>
    %75 = vector.extract_strided_slice %71 {offsets = [0, 60], sizes = [2, 20], strides = [1, 1]} : vector<2x80xf32> to vector<2x20xf32>
    %76 = arith.mulf %73, %53 : vector<2x20xf32>
    %77 = arith.mulf %72, %74 : vector<2x20xf32>
    %78 = arith.addf %76, %77 : vector<2x20xf32>
    %79 = math.tanh %78 : vector<2x20xf32>
    %80 = arith.mulf %75, %79 : vector<2x20xf32>
    %81 = vector.extract_strided_slice %80 {offsets = [0, 0], sizes = [2, 10], strides = [1, 1]} : vector<2x20xf32> to vector<2x10xf32>
    %c2 = arith.constant 2 : index
    %c0_18 = arith.constant 0 : index
    %82 = vector.load %arg12[%c2, %c0_18] : memref<16x10xf32, #tpu.memory_space<vmem>>, vector<2x10xf32>
    tpu.vector_store %arg12[%c2, %c0_18], %81 {strides = array<i32>} : memref<16x10xf32, #tpu.memory_space<vmem>>, vector<2x10xf32>,
    %83 = vector.extract_strided_slice %80 {offsets = [0, 10], sizes = [2, 10], strides = [1, 1]} : vector<2x20xf32> to vector<2x10xf32>
    %c12 = arith.constant 12 : index
    %c0_19 = arith.constant 0 : index
    %84 = vector.load %arg13[%c12, %c0_19] : memref<16x10xf32, #tpu.memory_space<vmem>>, vector<2x10xf32>
    tpu.vector_store %arg13[%c12, %c0_19], %83 {strides = array<i32>} : memref<16x10xf32, #tpu.memory_space<vmem>>, vector<2x10xf32>,
    %85 = vector.extract_strided_slice %31 {offsets = [4, 0], sizes = [2, 80], strides = [1, 1]} : vector<16x80xf32> to vector<2x80xf32>
    %86 = vector.extract_strided_slice %31 {offsets = [10, 0], sizes = [2, 80], strides = [1, 1]} : vector<16x80xf32> to vector<2x80xf32>
    %87 = arith.select %25, %85, %86 : vector<2x80xi1>, vector<2x80xf32>
    %cst_20 = arith.constant dense<0.000000e+00> : vector<2x80xf32>
    %88 = tpu.matmul %80, %32, %cst_20 {dimension_numbers = #tpu.dot_dimension_numbers<[1], [0], [0], [1], [0, 0, 1, 1], [], []>} : vector<2x20xf32>, vector<20x80xf32>, vector<2x80xf32> -> vector<2x80xf32>
    %89 = arith.addf %87, %88 : vector<2x80xf32>
    %90 = math.tanh %89 : vector<2x80xf32>
    %91 = arith.negf %89 : vector<2x80xf32>
    %92 = math.exp %91 : vector<2x80xf32>
    %cst_21 = arith.constant 1.000000e+00 : f32
    %93 = vector.broadcast %cst_21 : f32 to vector<2x80xf32>
    %94 = arith.addf %93, %92 : vector<2x80xf32>
    %95 = arith.divf %93, %94 : vector<2x80xf32>
    %96 = arith.select %5, %90, %95 : vector<2x80xi1>, vector<2x80xf32>
    %97 = vector.extract_strided_slice %96 {offsets = [0, 0], sizes = [2, 20], strides = [1, 1]} : vector<2x80xf32> to vector<2x20xf32>
    %98 = vector.extract_strided_slice %96 {offsets = [0, 20], sizes = [2, 20], strides = [1, 1]} : vector<2x80xf32> to vector<2x20xf32>
    %99 = vector.extract_strided_slice %96 {offsets = [0, 40], sizes = [2, 20], strides = [1, 1]} : vector<2x80xf32> to vector<2x20xf32>
    %100 = vector.extract_strided_slice %96 {offsets = [0, 60], sizes = [2, 20], strides = [1, 1]} : vector<2x80xf32> to vector<2x20xf32>
    %101 = arith.mulf %98, %78 : vector<2x20xf32>
    %102 = arith.mulf %97, %99 : vector<2x20xf32>
    %103 = arith.addf %101, %102 : vector<2x20xf32>
    %104 = math.tanh %103 : vector<2x20xf32>
    %105 = arith.mulf %100, %104 : vector<2x20xf32>
    %106 = vector.extract_strided_slice %105 {offsets = [0, 0], sizes = [2, 10], strides = [1, 1]} : vector<2x20xf32> to vector<2x10xf32>
    %c4 = arith.constant 4 : index
    %c0_22 = arith.constant 0 : index
    %107 = vector.load %arg12[%c4, %c0_22] : memref<16x10xf32, #tpu.memory_space<vmem>>, vector<2x10xf32>
    tpu.vector_store %arg12[%c4, %c0_22], %106 {strides = array<i32>} : memref<16x10xf32, #tpu.memory_space<vmem>>, vector<2x10xf32>,
    %108 = vector.extract_strided_slice %105 {offsets = [0, 10], sizes = [2, 10], strides = [1, 1]} : vector<2x20xf32> to vector<2x10xf32>
    %c10 = arith.constant 10 : index
    %c0_23 = arith.constant 0 : index
    %109 = vector.load %arg13[%c10, %c0_23] : memref<16x10xf32, #tpu.memory_space<vmem>>, vector<2x10xf32>
    tpu.vector_store %arg13[%c10, %c0_23], %108 {strides = array<i32>} : memref<16x10xf32, #tpu.memory_space<vmem>>, vector<2x10xf32>,
    %110 = vector.extract_strided_slice %31 {offsets = [6, 0], sizes = [2, 80], strides = [1, 1]} : vector<16x80xf32> to vector<2x80xf32>
    %111 = vector.extract_strided_slice %31 {offsets = [8, 0], sizes = [2, 80], strides = [1, 1]} : vector<16x80xf32> to vector<2x80xf32>
    %112 = arith.select %25, %110, %111 : vector<2x80xi1>, vector<2x80xf32>
    %cst_24 = arith.constant dense<0.000000e+00> : vector<2x80xf32>
    %113 = tpu.matmul %105, %32, %cst_24 {dimension_numbers = #tpu.dot_dimension_numbers<[1], [0], [0], [1], [0, 0, 1, 1], [], []>} : vector<2x20xf32>, vector<20x80xf32>, vector<2x80xf32> -> vector<2x80xf32>
    %114 = arith.addf %112, %113 : vector<2x80xf32>
    %115 = math.tanh %114 : vector<2x80xf32>
    %116 = arith.negf %114 : vector<2x80xf32>
    %117 = math.exp %116 : vector<2x80xf32>
    %cst_25 = arith.constant 1.000000e+00 : f32
    %118 = vector.broadcast %cst_25 : f32 to vector<2x80xf32>
    %119 = arith.addf %118, %117 : vector<2x80xf32>
    %120 = arith.divf %118, %119 : vector<2x80xf32>
    %121 = arith.select %5, %115, %120 : vector<2x80xi1>, vector<2x80xf32>
    %122 = vector.extract_strided_slice %121 {offsets = [0, 0], sizes = [2, 20], strides = [1, 1]} : vector<2x80xf32> to vector<2x20xf32>
    %123 = vector.extract_strided_slice %121 {offsets = [0, 20], sizes = [2, 20], strides = [1, 1]} : vector<2x80xf32> to vector<2x20xf32>
    %124 = vector.extract_strided_slice %121 {offsets = [0, 40], sizes = [2, 20], strides = [1, 1]} : vector<2x80xf32> to vector<2x20xf32>
    %125 = vector.extract_strided_slice %121 {offsets = [0, 60], sizes = [2, 20], strides = [1, 1]} : vector<2x80xf32> to vector<2x20xf32>
    %126 = arith.mulf %123, %103 : vector<2x20xf32>
    %127 = arith.mulf %122, %124 : vector<2x20xf32>
    %128 = arith.addf %126, %127 : vector<2x20xf32>
    %129 = math.tanh %128 : vector<2x20xf32>
    %130 = arith.mulf %125, %129 : vector<2x20xf32>
    %131 = vector.extract_strided_slice %130 {offsets = [0, 0], sizes = [2, 10], strides = [1, 1]} : vector<2x20xf32> to vector<2x10xf32>
    %c6 = arith.constant 6 : index
    %c0_26 = arith.constant 0 : index
    %132 = vector.load %arg12[%c6, %c0_26] : memref<16x10xf32, #tpu.memory_space<vmem>>, vector<2x10xf32>
    tpu.vector_store %arg12[%c6, %c0_26], %131 {strides = array<i32>} : memref<16x10xf32, #tpu.memory_space<vmem>>, vector<2x10xf32>,
    %133 = vector.extract_strided_slice %130 {offsets = [0, 10], sizes = [2, 10], strides = [1, 1]} : vector<2x20xf32> to vector<2x10xf32>
    %c8 = arith.constant 8 : index
    %c0_27 = arith.constant 0 : index
    %134 = vector.load %arg13[%c8, %c0_27] : memref<16x10xf32, #tpu.memory_space<vmem>>, vector<2x10xf32>
    tpu.vector_store %arg13[%c8, %c0_27], %133 {strides = array<i32>} : memref<16x10xf32, #tpu.memory_space<vmem>>, vector<2x10xf32>,
    %135 = vector.extract_strided_slice %31 {offsets = [8, 0], sizes = [2, 80], strides = [1, 1]} : vector<16x80xf32> to vector<2x80xf32>
    %136 = vector.extract_strided_slice %31 {offsets = [6, 0], sizes = [2, 80], strides = [1, 1]} : vector<16x80xf32> to vector<2x80xf32>
    %137 = arith.select %25, %135, %136 : vector<2x80xi1>, vector<2x80xf32>
    %cst_28 = arith.constant dense<0.000000e+00> : vector<2x80xf32>
    %138 = tpu.matmul %130, %32, %cst_28 {dimension_numbers = #tpu.dot_dimension_numbers<[1], [0], [0], [1], [0, 0, 1, 1], [], []>} : vector<2x20xf32>, vector<20x80xf32>, vector<2x80xf32> -> vector<2x80xf32>
    %139 = arith.addf %137, %138 : vector<2x80xf32>
    %140 = math.tanh %139 : vector<2x80xf32>
    %141 = arith.negf %139 : vector<2x80xf32>
    %142 = math.exp %141 : vector<2x80xf32>
    %cst_29 = arith.constant 1.000000e+00 : f32
    %143 = vector.broadcast %cst_29 : f32 to vector<2x80xf32>
    %144 = arith.addf %143, %142 : vector<2x80xf32>
    %145 = arith.divf %143, %144 : vector<2x80xf32>
    %146 = arith.select %5, %140, %145 : vector<2x80xi1>, vector<2x80xf32>
    %147 = vector.extract_strided_slice %146 {offsets = [0, 0], sizes = [2, 20], strides = [1, 1]} : vector<2x80xf32> to vector<2x20xf32>
    %148 = vector.extract_strided_slice %146 {offsets = [0, 20], sizes = [2, 20], strides = [1, 1]} : vector<2x80xf32> to vector<2x20xf32>
    %149 = vector.extract_strided_slice %146 {offsets = [0, 40], sizes = [2, 20], strides = [1, 1]} : vector<2x80xf32> to vector<2x20xf32>
    %150 = vector.extract_strided_slice %146 {offsets = [0, 60], sizes = [2, 20], strides = [1, 1]} : vector<2x80xf32> to vector<2x20xf32>
    %151 = arith.mulf %148, %128 : vector<2x20xf32>
    %152 = arith.mulf %147, %149 : vector<2x20xf32>
    %153 = arith.addf %151, %152 : vector<2x20xf32>
    %154 = math.tanh %153 : vector<2x20xf32>
    %155 = arith.mulf %150, %154 : vector<2x20xf32>
    %156 = vector.extract_strided_slice %155 {offsets = [0, 0], sizes = [2, 10], strides = [1, 1]} : vector<2x20xf32> to vector<2x10xf32>
    %c8_30 = arith.constant 8 : index
    %c0_31 = arith.constant 0 : index
    %157 = vector.load %arg12[%c8_30, %c0_31] : memref<16x10xf32, #tpu.memory_space<vmem>>, vector<2x10xf32>
    tpu.vector_store %arg12[%c8_30, %c0_31], %156 {strides = array<i32>} : memref<16x10xf32, #tpu.memory_space<vmem>>, vector<2x10xf32>,
    %158 = vector.extract_strided_slice %155 {offsets = [0, 10], sizes = [2, 10], strides = [1, 1]} : vector<2x20xf32> to vector<2x10xf32>
    %c6_32 = arith.constant 6 : index
    %c0_33 = arith.constant 0 : index
    %159 = vector.load %arg13[%c6_32, %c0_33] : memref<16x10xf32, #tpu.memory_space<vmem>>, vector<2x10xf32>
    tpu.vector_store %arg13[%c6_32, %c0_33], %158 {strides = array<i32>} : memref<16x10xf32, #tpu.memory_space<vmem>>, vector<2x10xf32>,
    %160 = vector.extract_strided_slice %31 {offsets = [10, 0], sizes = [2, 80], strides = [1, 1]} : vector<16x80xf32> to vector<2x80xf32>
    %161 = vector.extract_strided_slice %31 {offsets = [4, 0], sizes = [2, 80], strides = [1, 1]} : vector<16x80xf32> to vector<2x80xf32>
    %162 = arith.select %25, %160, %161 : vector<2x80xi1>, vector<2x80xf32>
    %cst_34 = arith.constant dense<0.000000e+00> : vector<2x80xf32>
    %163 = tpu.matmul %155, %32, %cst_34 {dimension_numbers = #tpu.dot_dimension_numbers<[1], [0], [0], [1], [0, 0, 1, 1], [], []>} : vector<2x20xf32>, vector<20x80xf32>, vector<2x80xf32> -> vector<2x80xf32>
    %164 = arith.addf %162, %163 : vector<2x80xf32>
    %165 = math.tanh %164 : vector<2x80xf32>
    %166 = arith.negf %164 : vector<2x80xf32>
    %167 = math.exp %166 : vector<2x80xf32>
    %cst_35 = arith.constant 1.000000e+00 : f32
    %168 = vector.broadcast %cst_35 : f32 to vector<2x80xf32>
    %169 = arith.addf %168, %167 : vector<2x80xf32>
    %170 = arith.divf %168, %169 : vector<2x80xf32>
    %171 = arith.select %5, %165, %170 : vector<2x80xi1>, vector<2x80xf32>
    %172 = vector.extract_strided_slice %171 {offsets = [0, 0], sizes = [2, 20], strides = [1, 1]} : vector<2x80xf32> to vector<2x20xf32>
    %173 = vector.extract_strided_slice %171 {offsets = [0, 20], sizes = [2, 20], strides = [1, 1]} : vector<2x80xf32> to vector<2x20xf32>
    %174 = vector.extract_strided_slice %171 {offsets = [0, 40], sizes = [2, 20], strides = [1, 1]} : vector<2x80xf32> to vector<2x20xf32>
    %175 = vector.extract_strided_slice %171 {offsets = [0, 60], sizes = [2, 20], strides = [1, 1]} : vector<2x80xf32> to vector<2x20xf32>
    %176 = arith.mulf %173, %153 : vector<2x20xf32>
    %177 = arith.mulf %172, %174 : vector<2x20xf32>
    %178 = arith.addf %176, %177 : vector<2x20xf32>
    %179 = math.tanh %178 : vector<2x20xf32>
    %180 = arith.mulf %175, %179 : vector<2x20xf32>
    %181 = vector.extract_strided_slice %180 {offsets = [0, 0], sizes = [2, 10], strides = [1, 1]} : vector<2x20xf32> to vector<2x10xf32>
    %c10_36 = arith.constant 10 : index
    %c0_37 = arith.constant 0 : index
    %182 = vector.load %arg12[%c10_36, %c0_37] : memref<16x10xf32, #tpu.memory_space<vmem>>, vector<2x10xf32>
    tpu.vector_store %arg12[%c10_36, %c0_37], %181 {strides = array<i32>} : memref<16x10xf32, #tpu.memory_space<vmem>>, vector<2x10xf32>,
    %183 = vector.extract_strided_slice %180 {offsets = [0, 10], sizes = [2, 10], strides = [1, 1]} : vector<2x20xf32> to vector<2x10xf32>
    %c4_38 = arith.constant 4 : index
    %c0_39 = arith.constant 0 : index
    %184 = vector.load %arg13[%c4_38, %c0_39] : memref<16x10xf32, #tpu.memory_space<vmem>>, vector<2x10xf32>
    tpu.vector_store %arg13[%c4_38, %c0_39], %183 {strides = array<i32>} : memref<16x10xf32, #tpu.memory_space<vmem>>, vector<2x10xf32>,
    %185 = vector.extract_strided_slice %31 {offsets = [12, 0], sizes = [2, 80], strides = [1, 1]} : vector<16x80xf32> to vector<2x80xf32>
    %186 = vector.extract_strided_slice %31 {offsets = [2, 0], sizes = [2, 80], strides = [1, 1]} : vector<16x80xf32> to vector<2x80xf32>
    %187 = arith.select %25, %185, %186 : vector<2x80xi1>, vector<2x80xf32>
    %cst_40 = arith.constant dense<0.000000e+00> : vector<2x80xf32>
    %188 = tpu.matmul %180, %32, %cst_40 {dimension_numbers = #tpu.dot_dimension_numbers<[1], [0], [0], [1], [0, 0, 1, 1], [], []>} : vector<2x20xf32>, vector<20x80xf32>, vector<2x80xf32> -> vector<2x80xf32>
    %189 = arith.addf %187, %188 : vector<2x80xf32>
    %190 = math.tanh %189 : vector<2x80xf32>
    %191 = arith.negf %189 : vector<2x80xf32>
    %192 = math.exp %191 : vector<2x80xf32>
    %cst_41 = arith.constant 1.000000e+00 : f32
    %193 = vector.broadcast %cst_41 : f32 to vector<2x80xf32>
    %194 = arith.addf %193, %192 : vector<2x80xf32>
    %195 = arith.divf %193, %194 : vector<2x80xf32>
    %196 = arith.select %5, %190, %195 : vector<2x80xi1>, vector<2x80xf32>
    %197 = vector.extract_strided_slice %196 {offsets = [0, 0], sizes = [2, 20], strides = [1, 1]} : vector<2x80xf32> to vector<2x20xf32>
    %198 = vector.extract_strided_slice %196 {offsets = [0, 20], sizes = [2, 20], strides = [1, 1]} : vector<2x80xf32> to vector<2x20xf32>
    %199 = vector.extract_strided_slice %196 {offsets = [0, 40], sizes = [2, 20], strides = [1, 1]} : vector<2x80xf32> to vector<2x20xf32>
    %200 = vector.extract_strided_slice %196 {offsets = [0, 60], sizes = [2, 20], strides = [1, 1]} : vector<2x80xf32> to vector<2x20xf32>
    %201 = arith.mulf %198, %178 : vector<2x20xf32>
    %202 = arith.mulf %197, %199 : vector<2x20xf32>
    %203 = arith.addf %201, %202 : vector<2x20xf32>
    %204 = math.tanh %203 : vector<2x20xf32>
    %205 = arith.mulf %200, %204 : vector<2x20xf32>
    %206 = vector.extract_strided_slice %205 {offsets = [0, 0], sizes = [2, 10], strides = [1, 1]} : vector<2x20xf32> to vector<2x10xf32>
    %c12_42 = arith.constant 12 : index
    %c0_43 = arith.constant 0 : index
    %207 = vector.load %arg12[%c12_42, %c0_43] : memref<16x10xf32, #tpu.memory_space<vmem>>, vector<2x10xf32>
    tpu.vector_store %arg12[%c12_42, %c0_43], %206 {strides = array<i32>} : memref<16x10xf32, #tpu.memory_space<vmem>>, vector<2x10xf32>,
    %208 = vector.extract_strided_slice %205 {offsets = [0, 10], sizes = [2, 10], strides = [1, 1]} : vector<2x20xf32> to vector<2x10xf32>
    %c2_44 = arith.constant 2 : index
    %c0_45 = arith.constant 0 : index
    %209 = vector.load %arg13[%c2_44, %c0_45] : memref<16x10xf32, #tpu.memory_space<vmem>>, vector<2x10xf32>
    tpu.vector_store %arg13[%c2_44, %c0_45], %208 {strides = array<i32>} : memref<16x10xf32, #tpu.memory_space<vmem>>, vector<2x10xf32>,
    %210 = vector.extract_strided_slice %31 {offsets = [14, 0], sizes = [2, 80], strides = [1, 1]} : vector<16x80xf32> to vector<2x80xf32>
    %211 = vector.extract_strided_slice %31 {offsets = [0, 0], sizes = [2, 80], strides = [1, 1]} : vector<16x80xf32> to vector<2x80xf32>
    %212 = arith.select %25, %210, %211 : vector<2x80xi1>, vector<2x80xf32>
    %cst_46 = arith.constant dense<0.000000e+00> : vector<2x80xf32>
    %213 = tpu.matmul %205, %32, %cst_46 {dimension_numbers = #tpu.dot_dimension_numbers<[1], [0], [0], [1], [0, 0, 1, 1], [], []>} : vector<2x20xf32>, vector<20x80xf32>, vector<2x80xf32> -> vector<2x80xf32>
    %214 = arith.addf %212, %213 : vector<2x80xf32>
    %215 = math.tanh %214 : vector<2x80xf32>
    %216 = arith.negf %214 : vector<2x80xf32>
    %217 = math.exp %216 : vector<2x80xf32>
    %cst_47 = arith.constant 1.000000e+00 : f32
    %218 = vector.broadcast %cst_47 : f32 to vector<2x80xf32>
    %219 = arith.addf %218, %217 : vector<2x80xf32>
    %220 = arith.divf %218, %219 : vector<2x80xf32>
    %221 = arith.select %5, %215, %220 : vector<2x80xi1>, vector<2x80xf32>
    %222 = vector.extract_strided_slice %221 {offsets = [0, 0], sizes = [2, 20], strides = [1, 1]} : vector<2x80xf32> to vector<2x20xf32>
    %223 = vector.extract_strided_slice %221 {offsets = [0, 20], sizes = [2, 20], strides = [1, 1]} : vector<2x80xf32> to vector<2x20xf32>
    %224 = vector.extract_strided_slice %221 {offsets = [0, 40], sizes = [2, 20], strides = [1, 1]} : vector<2x80xf32> to vector<2x20xf32>
    %225 = vector.extract_strided_slice %221 {offsets = [0, 60], sizes = [2, 20], strides = [1, 1]} : vector<2x80xf32> to vector<2x20xf32>
    %226 = arith.mulf %223, %203 : vector<2x20xf32>
    %227 = arith.mulf %222, %224 : vector<2x20xf32>
    %228 = arith.addf %226, %227 : vector<2x20xf32>
    %229 = math.tanh %228 : vector<2x20xf32>
    %230 = arith.mulf %225, %229 : vector<2x20xf32>
    %231 = vector.extract_strided_slice %230 {offsets = [0, 0], sizes = [2, 10], strides = [1, 1]} : vector<2x20xf32> to vector<2x10xf32>
    %c14_48 = arith.constant 14 : index
    %c0_49 = arith.constant 0 : index
    %232 = vector.load %arg12[%c14_48, %c0_49] : memref<16x10xf32, #tpu.memory_space<vmem>>, vector<2x10xf32>
    tpu.vector_store %arg12[%c14_48, %c0_49], %231 {strides = array<i32>} : memref<16x10xf32, #tpu.memory_space<vmem>>, vector<2x10xf32>,
    %233 = vector.extract_strided_slice %230 {offsets = [0, 10], sizes = [2, 10], strides = [1, 1]} : vector<2x20xf32> to vector<2x10xf32>
    %c0_50 = arith.constant 0 : index
    %c0_51 = arith.constant 0 : index
    %234 = vector.load %arg13[%c0_50, %c0_51] : memref<16x10xf32, #tpu.memory_space<vmem>>, vector<2x10xf32>
    tpu.vector_store %arg13[%c0_50, %c0_51], %233 {strides = array<i32>} : memref<16x10xf32, #tpu.memory_space<vmem>>, vector<2x10xf32>,
    %c0_52 = arith.constant 0 : index
    %c0_53 = arith.constant 0 : index
    %235 = vector.load %arg12[%c0_52, %c0_53] : memref<16x10xf32, #tpu.memory_space<vmem>>, vector<16x10xf32>
    %c0_54 = arith.constant 0 : index
    %c0_55 = arith.constant 0 : index
    %236 = vector.load %arg4[%c0_54, %c0_55] : memref<10x80xf32, #tpu.memory_space<vmem>>, vector<10x80xf32>
    %cst_56 = arith.constant dense<0.000000e+00> : vector<16x80xf32>
    %237 = tpu.matmul %235, %236, %cst_56 {dimension_numbers = #tpu.dot_dimension_numbers<[1], [0], [0], [1], [0, 0, 1, 1], [], []>} : vector<16x10xf32>, vector<10x80xf32>, vector<16x80xf32> -> vector<16x80xf32>
    %c0_57 = arith.constant 0 : index
    %c0_58 = arith.constant 0 : index
    %238 = vector.load %arg13[%c0_57, %c0_58] : memref<16x10xf32, #tpu.memory_space<vmem>>, vector<16x10xf32>
    %c0_59 = arith.constant 0 : index
    %c0_60 = arith.constant 0 : index
    %239 = vector.load %arg5[%c0_59, %c0_60] : memref<10x80xf32, #tpu.memory_space<vmem>>, vector<10x80xf32>
    %cst_61 = arith.constant dense<0.000000e+00> : vector<16x80xf32>
    %240 = tpu.matmul %238, %239, %cst_61 {dimension_numbers = #tpu.dot_dimension_numbers<[1], [0], [0], [1], [0, 0, 1, 1], [], []>} : vector<16x10xf32>, vector<10x80xf32>, vector<16x80xf32> -> vector<16x80xf32>
    %241 = arith.addf %237, %240 : vector<16x80xf32>
    %c0_62 = arith.constant 0 : index
    %c0_63 = arith.constant 0 : index
    %242 = vector.load %arg7[%c0_62, %c0_63] : memref<1x80xf32, #tpu.memory_space<vmem>>, vector<1x80xf32>
    %243 = vector.broadcast %242 : vector<1x80xf32> to vector<16x80xf32>
    %244 = arith.addf %241, %243 : vector<16x80xf32>
    %c0_64 = arith.constant 0 : index
    %c0_65 = arith.constant 0 : index
    %245 = vector.load %arg6[%c0_64, %c0_65] : memref<20x80xf32, #tpu.memory_space<vmem>>, vector<20x80xf32>
    %cst_66 = arith.constant 0.000000e+00 : f32
    %246 = vector.broadcast %cst_66 : f32 to vector<2x20xf32>
    %cst_67 = arith.constant 0.000000e+00 : f32
    %247 = vector.broadcast %cst_67 : f32 to vector<2x20xf32>
    %248 = vector.extract_strided_slice %244 {offsets = [0, 0], sizes = [2, 80], strides = [1, 1]} : vector<16x80xf32> to vector<2x80xf32>
    %249 = vector.extract_strided_slice %244 {offsets = [14, 0], sizes = [2, 80], strides = [1, 1]} : vector<16x80xf32> to vector<2x80xf32>
    %250 = arith.select %25, %248, %249 : vector<2x80xi1>, vector<2x80xf32>
    %cst_68 = arith.constant dense<0.000000e+00> : vector<2x80xf32>
    %251 = tpu.matmul %246, %245, %cst_68 {dimension_numbers = #tpu.dot_dimension_numbers<[1], [0], [0], [1], [0, 0, 1, 1], [], []>} : vector<2x20xf32>, vector<20x80xf32>, vector<2x80xf32> -> vector<2x80xf32>
    %252 = arith.addf %250, %251 : vector<2x80xf32>
    %253 = math.tanh %252 : vector<2x80xf32>
    %254 = arith.negf %252 : vector<2x80xf32>
    %255 = math.exp %254 : vector<2x80xf32>
    %cst_69 = arith.constant 1.000000e+00 : f32
    %256 = vector.broadcast %cst_69 : f32 to vector<2x80xf32>
    %257 = arith.addf %256, %255 : vector<2x80xf32>
    %258 = arith.divf %256, %257 : vector<2x80xf32>
    %259 = arith.select %5, %253, %258 : vector<2x80xi1>, vector<2x80xf32>
    %260 = vector.extract_strided_slice %259 {offsets = [0, 0], sizes = [2, 20], strides = [1, 1]} : vector<2x80xf32> to vector<2x20xf32>
    %261 = vector.extract_strided_slice %259 {offsets = [0, 20], sizes = [2, 20], strides = [1, 1]} : vector<2x80xf32> to vector<2x20xf32>
    %262 = vector.extract_strided_slice %259 {offsets = [0, 40], sizes = [2, 20], strides = [1, 1]} : vector<2x80xf32> to vector<2x20xf32>
    %263 = vector.extract_strided_slice %259 {offsets = [0, 60], sizes = [2, 20], strides = [1, 1]} : vector<2x80xf32> to vector<2x20xf32>
    %264 = arith.mulf %261, %247 : vector<2x20xf32>
    %265 = arith.mulf %260, %262 : vector<2x20xf32>
    %266 = arith.addf %264, %265 : vector<2x20xf32>
    %267 = math.tanh %266 : vector<2x20xf32>
    %268 = arith.mulf %263, %267 : vector<2x20xf32>
    %269 = vector.extract_strided_slice %268 {offsets = [0, 0], sizes = [2, 10], strides = [1, 1]} : vector<2x20xf32> to vector<2x10xf32>
    %c0_70 = arith.constant 0 : index
    %c0_71 = arith.constant 0 : index
    %270 = vector.load %arg14[%c0_70, %c0_71] : memref<16x10xf32, #tpu.memory_space<vmem>>, vector<2x10xf32>
    tpu.vector_store %arg14[%c0_70, %c0_71], %269 {strides = array<i32>} : memref<16x10xf32, #tpu.memory_space<vmem>>, vector<2x10xf32>,
    %271 = vector.extract_strided_slice %268 {offsets = [0, 10], sizes = [2, 10], strides = [1, 1]} : vector<2x20xf32> to vector<2x10xf32>
    %c14_72 = arith.constant 14 : index
    %c0_73 = arith.constant 0 : index
    %272 = vector.load %arg15[%c14_72, %c0_73] : memref<16x10xf32, #tpu.memory_space<vmem>>, vector<2x10xf32>
    tpu.vector_store %arg15[%c14_72, %c0_73], %271 {strides = array<i32>} : memref<16x10xf32, #tpu.memory_space<vmem>>, vector<2x10xf32>,
    %273 = vector.extract_strided_slice %244 {offsets = [2, 0], sizes = [2, 80], strides = [1, 1]} : vector<16x80xf32> to vector<2x80xf32>
    %274 = vector.extract_strided_slice %244 {offsets = [12, 0], sizes = [2, 80], strides = [1, 1]} : vector<16x80xf32> to vector<2x80xf32>
    %275 = arith.select %25, %273, %274 : vector<2x80xi1>, vector<2x80xf32>
    %cst_74 = arith.constant dense<0.000000e+00> : vector<2x80xf32>
    %276 = tpu.matmul %268, %245, %cst_74 {dimension_numbers = #tpu.dot_dimension_numbers<[1], [0], [0], [1], [0, 0, 1, 1], [], []>} : vector<2x20xf32>, vector<20x80xf32>, vector<2x80xf32> -> vector<2x80xf32>
    %277 = arith.addf %275, %276 : vector<2x80xf32>
    %278 = math.tanh %277 : vector<2x80xf32>
    %279 = arith.negf %277 : vector<2x80xf32>
    %280 = math.exp %279 : vector<2x80xf32>
    %cst_75 = arith.constant 1.000000e+00 : f32
    %281 = vector.broadcast %cst_75 : f32 to vector<2x80xf32>
    %282 = arith.addf %281, %280 : vector<2x80xf32>
    %283 = arith.divf %281, %282 : vector<2x80xf32>
    %284 = arith.select %5, %278, %283 : vector<2x80xi1>, vector<2x80xf32>
    %285 = vector.extract_strided_slice %284 {offsets = [0, 0], sizes = [2, 20], strides = [1, 1]} : vector<2x80xf32> to vector<2x20xf32>
    %286 = vector.extract_strided_slice %284 {offsets = [0, 20], sizes = [2, 20], strides = [1, 1]} : vector<2x80xf32> to vector<2x20xf32>
    %287 = vector.extract_strided_slice %284 {offsets = [0, 40], sizes = [2, 20], strides = [1, 1]} : vector<2x80xf32> to vector<2x20xf32>
    %288 = vector.extract_strided_slice %284 {offsets = [0, 60], sizes = [2, 20], strides = [1, 1]} : vector<2x80xf32> to vector<2x20xf32>
    %289 = arith.mulf %286, %266 : vector<2x20xf32>
    %290 = arith.mulf %285, %287 : vector<2x20xf32>
    %291 = arith.addf %289, %290 : vector<2x20xf32>
    %292 = math.tanh %291 : vector<2x20xf32>
    %293 = arith.mulf %288, %292 : vector<2x20xf32>
    %294 = vector.extract_strided_slice %293 {offsets = [0, 0], sizes = [2, 10], strides = [1, 1]} : vector<2x20xf32> to vector<2x10xf32>
    %c2_76 = arith.constant 2 : index
    %c0_77 = arith.constant 0 : index
    %295 = vector.load %arg14[%c2_76, %c0_77] : memref<16x10xf32, #tpu.memory_space<vmem>>, vector<2x10xf32>
    tpu.vector_store %arg14[%c2_76, %c0_77], %294 {strides = array<i32>} : memref<16x10xf32, #tpu.memory_space<vmem>>, vector<2x10xf32>,
    %296 = vector.extract_strided_slice %293 {offsets = [0, 10], sizes = [2, 10], strides = [1, 1]} : vector<2x20xf32> to vector<2x10xf32>
    %c12_78 = arith.constant 12 : index
    %c0_79 = arith.constant 0 : index
    %297 = vector.load %arg15[%c12_78, %c0_79] : memref<16x10xf32, #tpu.memory_space<vmem>>, vector<2x10xf32>
    tpu.vector_store %arg15[%c12_78, %c0_79], %296 {strides = array<i32>} : memref<16x10xf32, #tpu.memory_space<vmem>>, vector<2x10xf32>,
    %298 = vector.extract_strided_slice %244 {offsets = [4, 0], sizes = [2, 80], strides = [1, 1]} : vector<16x80xf32> to vector<2x80xf32>
    %299 = vector.extract_strided_slice %244 {offsets = [10, 0], sizes = [2, 80], strides = [1, 1]} : vector<16x80xf32> to vector<2x80xf32>
    %300 = arith.select %25, %298, %299 : vector<2x80xi1>, vector<2x80xf32>
    %cst_80 = arith.constant dense<0.000000e+00> : vector<2x80xf32>
    %301 = tpu.matmul %293, %245, %cst_80 {dimension_numbers = #tpu.dot_dimension_numbers<[1], [0], [0], [1], [0, 0, 1, 1], [], []>} : vector<2x20xf32>, vector<20x80xf32>, vector<2x80xf32> -> vector<2x80xf32>
    %302 = arith.addf %300, %301 : vector<2x80xf32>
    %303 = math.tanh %302 : vector<2x80xf32>
    %304 = arith.negf %302 : vector<2x80xf32>
    %305 = math.exp %304 : vector<2x80xf32>
    %cst_81 = arith.constant 1.000000e+00 : f32
    %306 = vector.broadcast %cst_81 : f32 to vector<2x80xf32>
    %307 = arith.addf %306, %305 : vector<2x80xf32>
    %308 = arith.divf %306, %307 : vector<2x80xf32>
    %309 = arith.select %5, %303, %308 : vector<2x80xi1>, vector<2x80xf32>
    %310 = vector.extract_strided_slice %309 {offsets = [0, 0], sizes = [2, 20], strides = [1, 1]} : vector<2x80xf32> to vector<2x20xf32>
    %311 = vector.extract_strided_slice %309 {offsets = [0, 20], sizes = [2, 20], strides = [1, 1]} : vector<2x80xf32> to vector<2x20xf32>
    %312 = vector.extract_strided_slice %309 {offsets = [0, 40], sizes = [2, 20], strides = [1, 1]} : vector<2x80xf32> to vector<2x20xf32>
    %313 = vector.extract_strided_slice %309 {offsets = [0, 60], sizes = [2, 20], strides = [1, 1]} : vector<2x80xf32> to vector<2x20xf32>
    %314 = arith.mulf %311, %291 : vector<2x20xf32>
    %315 = arith.mulf %310, %312 : vector<2x20xf32>
    %316 = arith.addf %314, %315 : vector<2x20xf32>
    %317 = math.tanh %316 : vector<2x20xf32>
    %318 = arith.mulf %313, %317 : vector<2x20xf32>
    %319 = vector.extract_strided_slice %318 {offsets = [0, 0], sizes = [2, 10], strides = [1, 1]} : vector<2x20xf32> to vector<2x10xf32>
    %c4_82 = arith.constant 4 : index
    %c0_83 = arith.constant 0 : index
    %320 = vector.load %arg14[%c4_82, %c0_83] : memref<16x10xf32, #tpu.memory_space<vmem>>, vector<2x10xf32>
    tpu.vector_store %arg14[%c4_82, %c0_83], %319 {strides = array<i32>} : memref<16x10xf32, #tpu.memory_space<vmem>>, vector<2x10xf32>,
    %321 = vector.extract_strided_slice %318 {offsets = [0, 10], sizes = [2, 10], strides = [1, 1]} : vector<2x20xf32> to vector<2x10xf32>
    %c10_84 = arith.constant 10 : index
    %c0_85 = arith.constant 0 : index
    %322 = vector.load %arg15[%c10_84, %c0_85] : memref<16x10xf32, #tpu.memory_space<vmem>>, vector<2x10xf32>
    tpu.vector_store %arg15[%c10_84, %c0_85], %321 {strides = array<i32>} : memref<16x10xf32, #tpu.memory_space<vmem>>, vector<2x10xf32>,
    %323 = vector.extract_strided_slice %244 {offsets = [6, 0], sizes = [2, 80], strides = [1, 1]} : vector<16x80xf32> to vector<2x80xf32>
    %324 = vector.extract_strided_slice %244 {offsets = [8, 0], sizes = [2, 80], strides = [1, 1]} : vector<16x80xf32> to vector<2x80xf32>
    %325 = arith.select %25, %323, %324 : vector<2x80xi1>, vector<2x80xf32>
    %cst_86 = arith.constant dense<0.000000e+00> : vector<2x80xf32>
    %326 = tpu.matmul %318, %245, %cst_86 {dimension_numbers = #tpu.dot_dimension_numbers<[1], [0], [0], [1], [0, 0, 1, 1], [], []>} : vector<2x20xf32>, vector<20x80xf32>, vector<2x80xf32> -> vector<2x80xf32>
    %327 = arith.addf %325, %326 : vector<2x80xf32>
    %328 = math.tanh %327 : vector<2x80xf32>
    %329 = arith.negf %327 : vector<2x80xf32>
    %330 = math.exp %329 : vector<2x80xf32>
    %cst_87 = arith.constant 1.000000e+00 : f32
    %331 = vector.broadcast %cst_87 : f32 to vector<2x80xf32>
    %332 = arith.addf %331, %330 : vector<2x80xf32>
    %333 = arith.divf %331, %332 : vector<2x80xf32>
    %334 = arith.select %5, %328, %333 : vector<2x80xi1>, vector<2x80xf32>
    %335 = vector.extract_strided_slice %334 {offsets = [0, 0], sizes = [2, 20], strides = [1, 1]} : vector<2x80xf32> to vector<2x20xf32>
    %336 = vector.extract_strided_slice %334 {offsets = [0, 20], sizes = [2, 20], strides = [1, 1]} : vector<2x80xf32> to vector<2x20xf32>
    %337 = vector.extract_strided_slice %334 {offsets = [0, 40], sizes = [2, 20], strides = [1, 1]} : vector<2x80xf32> to vector<2x20xf32>
    %338 = vector.extract_strided_slice %334 {offsets = [0, 60], sizes = [2, 20], strides = [1, 1]} : vector<2x80xf32> to vector<2x20xf32>
    %339 = arith.mulf %336, %316 : vector<2x20xf32>
    %340 = arith.mulf %335, %337 : vector<2x20xf32>
    %341 = arith.addf %339, %340 : vector<2x20xf32>
    %342 = math.tanh %341 : vector<2x20xf32>
    %343 = arith.mulf %338, %342 : vector<2x20xf32>
    %344 = vector.extract_strided_slice %343 {offsets = [0, 0], sizes = [2, 10], strides = [1, 1]} : vector<2x20xf32> to vector<2x10xf32>
    %c6_88 = arith.constant 6 : index
    %c0_89 = arith.constant 0 : index
    %345 = vector.load %arg14[%c6_88, %c0_89] : memref<16x10xf32, #tpu.memory_space<vmem>>, vector<2x10xf32>
    tpu.vector_store %arg14[%c6_88, %c0_89], %344 {strides = array<i32>} : memref<16x10xf32, #tpu.memory_space<vmem>>, vector<2x10xf32>,
    %346 = vector.extract_strided_slice %343 {offsets = [0, 10], sizes = [2, 10], strides = [1, 1]} : vector<2x20xf32> to vector<2x10xf32>
    %c8_90 = arith.constant 8 : index
    %c0_91 = arith.constant 0 : index
    %347 = vector.load %arg15[%c8_90, %c0_91] : memref<16x10xf32, #tpu.memory_space<vmem>>, vector<2x10xf32>
    tpu.vector_store %arg15[%c8_90, %c0_91], %346 {strides = array<i32>} : memref<16x10xf32, #tpu.memory_space<vmem>>, vector<2x10xf32>,
    %348 = vector.extract_strided_slice %244 {offsets = [8, 0], sizes = [2, 80], strides = [1, 1]} : vector<16x80xf32> to vector<2x80xf32>
    %349 = vector.extract_strided_slice %244 {offsets = [6, 0], sizes = [2, 80], strides = [1, 1]} : vector<16x80xf32> to vector<2x80xf32>
    %350 = arith.select %25, %348, %349 : vector<2x80xi1>, vector<2x80xf32>
    %cst_92 = arith.constant dense<0.000000e+00> : vector<2x80xf32>
    %351 = tpu.matmul %343, %245, %cst_92 {dimension_numbers = #tpu.dot_dimension_numbers<[1], [0], [0], [1], [0, 0, 1, 1], [], []>} : vector<2x20xf32>, vector<20x80xf32>, vector<2x80xf32> -> vector<2x80xf32>
    %352 = arith.addf %350, %351 : vector<2x80xf32>
    %353 = math.tanh %352 : vector<2x80xf32>
    %354 = arith.negf %352 : vector<2x80xf32>
    %355 = math.exp %354 : vector<2x80xf32>
    %cst_93 = arith.constant 1.000000e+00 : f32
    %356 = vector.broadcast %cst_93 : f32 to vector<2x80xf32>
    %357 = arith.addf %356, %355 : vector<2x80xf32>
    %358 = arith.divf %356, %357 : vector<2x80xf32>
    %359 = arith.select %5, %353, %358 : vector<2x80xi1>, vector<2x80xf32>
    %360 = vector.extract_strided_slice %359 {offsets = [0, 0], sizes = [2, 20], strides = [1, 1]} : vector<2x80xf32> to vector<2x20xf32>
    %361 = vector.extract_strided_slice %359 {offsets = [0, 20], sizes = [2, 20], strides = [1, 1]} : vector<2x80xf32> to vector<2x20xf32>
    %362 = vector.extract_strided_slice %359 {offsets = [0, 40], sizes = [2, 20], strides = [1, 1]} : vector<2x80xf32> to vector<2x20xf32>
    %363 = vector.extract_strided_slice %359 {offsets = [0, 60], sizes = [2, 20], strides = [1, 1]} : vector<2x80xf32> to vector<2x20xf32>
    %364 = arith.mulf %361, %341 : vector<2x20xf32>
    %365 = arith.mulf %360, %362 : vector<2x20xf32>
    %366 = arith.addf %364, %365 : vector<2x20xf32>
    %367 = math.tanh %366 : vector<2x20xf32>
    %368 = arith.mulf %363, %367 : vector<2x20xf32>
    %369 = vector.extract_strided_slice %368 {offsets = [0, 0], sizes = [2, 10], strides = [1, 1]} : vector<2x20xf32> to vector<2x10xf32>
    %c8_94 = arith.constant 8 : index
    %c0_95 = arith.constant 0 : index
    %370 = vector.load %arg14[%c8_94, %c0_95] : memref<16x10xf32, #tpu.memory_space<vmem>>, vector<2x10xf32>
    tpu.vector_store %arg14[%c8_94, %c0_95], %369 {strides = array<i32>} : memref<16x10xf32, #tpu.memory_space<vmem>>, vector<2x10xf32>,
    %371 = vector.extract_strided_slice %368 {offsets = [0, 10], sizes = [2, 10], strides = [1, 1]} : vector<2x20xf32> to vector<2x10xf32>
    %c6_96 = arith.constant 6 : index
    %c0_97 = arith.constant 0 : index
    %372 = vector.load %arg15[%c6_96, %c0_97] : memref<16x10xf32, #tpu.memory_space<vmem>>, vector<2x10xf32>
    tpu.vector_store %arg15[%c6_96, %c0_97], %371 {strides = array<i32>} : memref<16x10xf32, #tpu.memory_space<vmem>>, vector<2x10xf32>,
    %373 = vector.extract_strided_slice %244 {offsets = [10, 0], sizes = [2, 80], strides = [1, 1]} : vector<16x80xf32> to vector<2x80xf32>
    %374 = vector.extract_strided_slice %244 {offsets = [4, 0], sizes = [2, 80], strides = [1, 1]} : vector<16x80xf32> to vector<2x80xf32>
    %375 = arith.select %25, %373, %374 : vector<2x80xi1>, vector<2x80xf32>
    %cst_98 = arith.constant dense<0.000000e+00> : vector<2x80xf32>
    %376 = tpu.matmul %368, %245, %cst_98 {dimension_numbers = #tpu.dot_dimension_numbers<[1], [0], [0], [1], [0, 0, 1, 1], [], []>} : vector<2x20xf32>, vector<20x80xf32>, vector<2x80xf32> -> vector<2x80xf32>
    %377 = arith.addf %375, %376 : vector<2x80xf32>
    %378 = math.tanh %377 : vector<2x80xf32>
    %379 = arith.negf %377 : vector<2x80xf32>
    %380 = math.exp %379 : vector<2x80xf32>
    %cst_99 = arith.constant 1.000000e+00 : f32
    %381 = vector.broadcast %cst_99 : f32 to vector<2x80xf32>
    %382 = arith.addf %381, %380 : vector<2x80xf32>
    %383 = arith.divf %381, %382 : vector<2x80xf32>
    %384 = arith.select %5, %378, %383 : vector<2x80xi1>, vector<2x80xf32>
    %385 = vector.extract_strided_slice %384 {offsets = [0, 0], sizes = [2, 20], strides = [1, 1]} : vector<2x80xf32> to vector<2x20xf32>
    %386 = vector.extract_strided_slice %384 {offsets = [0, 20], sizes = [2, 20], strides = [1, 1]} : vector<2x80xf32> to vector<2x20xf32>
    %387 = vector.extract_strided_slice %384 {offsets = [0, 40], sizes = [2, 20], strides = [1, 1]} : vector<2x80xf32> to vector<2x20xf32>
    %388 = vector.extract_strided_slice %384 {offsets = [0, 60], sizes = [2, 20], strides = [1, 1]} : vector<2x80xf32> to vector<2x20xf32>
    %389 = arith.mulf %386, %366 : vector<2x20xf32>
    %390 = arith.mulf %385, %387 : vector<2x20xf32>
    %391 = arith.addf %389, %390 : vector<2x20xf32>
    %392 = math.tanh %391 : vector<2x20xf32>
    %393 = arith.mulf %388, %392 : vector<2x20xf32>
    %394 = vector.extract_strided_slice %393 {offsets = [0, 0], sizes = [2, 10], strides = [1, 1]} : vector<2x20xf32> to vector<2x10xf32>
    %c10_100 = arith.constant 10 : index
    %c0_101 = arith.constant 0 : index
    %395 = vector.load %arg14[%c10_100, %c0_101] : memref<16x10xf32, #tpu.memory_space<vmem>>, vector<2x10xf32>
    tpu.vector_store %arg14[%c10_100, %c0_101], %394 {strides = array<i32>} : memref<16x10xf32, #tpu.memory_space<vmem>>, vector<2x10xf32>,
    %396 = vector.extract_strided_slice %393 {offsets = [0, 10], sizes = [2, 10], strides = [1, 1]} : vector<2x20xf32> to vector<2x10xf32>
    %c4_102 = arith.constant 4 : index
    %c0_103 = arith.constant 0 : index
    %397 = vector.load %arg15[%c4_102, %c0_103] : memref<16x10xf32, #tpu.memory_space<vmem>>, vector<2x10xf32>
    tpu.vector_store %arg15[%c4_102, %c0_103], %396 {strides = array<i32>} : memref<16x10xf32, #tpu.memory_space<vmem>>, vector<2x10xf32>,
    %398 = vector.extract_strided_slice %244 {offsets = [12, 0], sizes = [2, 80], strides = [1, 1]} : vector<16x80xf32> to vector<2x80xf32>
    %399 = vector.extract_strided_slice %244 {offsets = [2, 0], sizes = [2, 80], strides = [1, 1]} : vector<16x80xf32> to vector<2x80xf32>
    %400 = arith.select %25, %398, %399 : vector<2x80xi1>, vector<2x80xf32>
    %cst_104 = arith.constant dense<0.000000e+00> : vector<2x80xf32>
    %401 = tpu.matmul %393, %245, %cst_104 {dimension_numbers = #tpu.dot_dimension_numbers<[1], [0], [0], [1], [0, 0, 1, 1], [], []>} : vector<2x20xf32>, vector<20x80xf32>, vector<2x80xf32> -> vector<2x80xf32>
    %402 = arith.addf %400, %401 : vector<2x80xf32>
    %403 = math.tanh %402 : vector<2x80xf32>
    %404 = arith.negf %402 : vector<2x80xf32>
    %405 = math.exp %404 : vector<2x80xf32>
    %cst_105 = arith.constant 1.000000e+00 : f32
    %406 = vector.broadcast %cst_105 : f32 to vector<2x80xf32>
    %407 = arith.addf %406, %405 : vector<2x80xf32>
    %408 = arith.divf %406, %407 : vector<2x80xf32>
    %409 = arith.select %5, %403, %408 : vector<2x80xi1>, vector<2x80xf32>
    %410 = vector.extract_strided_slice %409 {offsets = [0, 0], sizes = [2, 20], strides = [1, 1]} : vector<2x80xf32> to vector<2x20xf32>
    %411 = vector.extract_strided_slice %409 {offsets = [0, 20], sizes = [2, 20], strides = [1, 1]} : vector<2x80xf32> to vector<2x20xf32>
    %412 = vector.extract_strided_slice %409 {offsets = [0, 40], sizes = [2, 20], strides = [1, 1]} : vector<2x80xf32> to vector<2x20xf32>
    %413 = vector.extract_strided_slice %409 {offsets = [0, 60], sizes = [2, 20], strides = [1, 1]} : vector<2x80xf32> to vector<2x20xf32>
    %414 = arith.mulf %411, %391 : vector<2x20xf32>
    %415 = arith.mulf %410, %412 : vector<2x20xf32>
    %416 = arith.addf %414, %415 : vector<2x20xf32>
    %417 = math.tanh %416 : vector<2x20xf32>
    %418 = arith.mulf %413, %417 : vector<2x20xf32>
    %419 = vector.extract_strided_slice %418 {offsets = [0, 0], sizes = [2, 10], strides = [1, 1]} : vector<2x20xf32> to vector<2x10xf32>
    %c12_106 = arith.constant 12 : index
    %c0_107 = arith.constant 0 : index
    %420 = vector.load %arg14[%c12_106, %c0_107] : memref<16x10xf32, #tpu.memory_space<vmem>>, vector<2x10xf32>
    tpu.vector_store %arg14[%c12_106, %c0_107], %419 {strides = array<i32>} : memref<16x10xf32, #tpu.memory_space<vmem>>, vector<2x10xf32>,
    %421 = vector.extract_strided_slice %418 {offsets = [0, 10], sizes = [2, 10], strides = [1, 1]} : vector<2x20xf32> to vector<2x10xf32>
    %c2_108 = arith.constant 2 : index
    %c0_109 = arith.constant 0 : index
    %422 = vector.load %arg15[%c2_108, %c0_109] : memref<16x10xf32, #tpu.memory_space<vmem>>, vector<2x10xf32>
    tpu.vector_store %arg15[%c2_108, %c0_109], %421 {strides = array<i32>} : memref<16x10xf32, #tpu.memory_space<vmem>>, vector<2x10xf32>,
    %423 = vector.extract_strided_slice %244 {offsets = [14, 0], sizes = [2, 80], strides = [1, 1]} : vector<16x80xf32> to vector<2x80xf32>
    %424 = vector.extract_strided_slice %244 {offsets = [0, 0], sizes = [2, 80], strides = [1, 1]} : vector<16x80xf32> to vector<2x80xf32>
    %425 = arith.select %25, %423, %424 : vector<2x80xi1>, vector<2x80xf32>
    %cst_110 = arith.constant dense<0.000000e+00> : vector<2x80xf32>
    %426 = tpu.matmul %418, %245, %cst_110 {dimension_numbers = #tpu.dot_dimension_numbers<[1], [0], [0], [1], [0, 0, 1, 1], [], []>} : vector<2x20xf32>, vector<20x80xf32>, vector<2x80xf32> -> vector<2x80xf32>
    %427 = arith.addf %425, %426 : vector<2x80xf32>
    %428 = math.tanh %427 : vector<2x80xf32>
    %429 = arith.negf %427 : vector<2x80xf32>
    %430 = math.exp %429 : vector<2x80xf32>
    %cst_111 = arith.constant 1.000000e+00 : f32
    %431 = vector.broadcast %cst_111 : f32 to vector<2x80xf32>
    %432 = arith.addf %431, %430 : vector<2x80xf32>
    %433 = arith.divf %431, %432 : vector<2x80xf32>
    %434 = arith.select %5, %428, %433 : vector<2x80xi1>, vector<2x80xf32>
    %435 = vector.extract_strided_slice %434 {offsets = [0, 0], sizes = [2, 20], strides = [1, 1]} : vector<2x80xf32> to vector<2x20xf32>
    %436 = vector.extract_strided_slice %434 {offsets = [0, 20], sizes = [2, 20], strides = [1, 1]} : vector<2x80xf32> to vector<2x20xf32>
    %437 = vector.extract_strided_slice %434 {offsets = [0, 40], sizes = [2, 20], strides = [1, 1]} : vector<2x80xf32> to vector<2x20xf32>
    %438 = vector.extract_strided_slice %434 {offsets = [0, 60], sizes = [2, 20], strides = [1, 1]} : vector<2x80xf32> to vector<2x20xf32>
    %439 = arith.mulf %436, %416 : vector<2x20xf32>
    %440 = arith.mulf %435, %437 : vector<2x20xf32>
    %441 = arith.addf %439, %440 : vector<2x20xf32>
    %442 = math.tanh %441 : vector<2x20xf32>
    %443 = arith.mulf %438, %442 : vector<2x20xf32>
    %444 = vector.extract_strided_slice %443 {offsets = [0, 0], sizes = [2, 10], strides = [1, 1]} : vector<2x20xf32> to vector<2x10xf32>
    %c14_112 = arith.constant 14 : index
    %c0_113 = arith.constant 0 : index
    %445 = vector.load %arg14[%c14_112, %c0_113] : memref<16x10xf32, #tpu.memory_space<vmem>>, vector<2x10xf32>
    tpu.vector_store %arg14[%c14_112, %c0_113], %444 {strides = array<i32>} : memref<16x10xf32, #tpu.memory_space<vmem>>, vector<2x10xf32>,
    %446 = vector.extract_strided_slice %443 {offsets = [0, 10], sizes = [2, 10], strides = [1, 1]} : vector<2x20xf32> to vector<2x10xf32>
    %c0_114 = arith.constant 0 : index
    %c0_115 = arith.constant 0 : index
    %447 = vector.load %arg15[%c0_114, %c0_115] : memref<16x10xf32, #tpu.memory_space<vmem>>, vector<2x10xf32>
    tpu.vector_store %arg15[%c0_114, %c0_115], %446 {strides = array<i32>} : memref<16x10xf32, #tpu.memory_space<vmem>>, vector<2x10xf32>,
    %c0_116 = arith.constant 0 : index
    %c0_117 = arith.constant 0 : index
    %448 = vector.load %arg14[%c0_116, %c0_117] : memref<16x10xf32, #tpu.memory_space<vmem>>, vector<16x10xf32>
    %c0_118 = arith.constant 0 : index
    %c0_119 = arith.constant 0 : index
    %449 = vector.load %arg8[%c0_118, %c0_119] : memref<1x10xf32, #tpu.memory_space<vmem>>, vector<1x10xf32>
    %450 = vector.broadcast %449 : vector<1x10xf32> to vector<16x10xf32>
    %451 = arith.mulf %448, %450 : vector<16x10xf32>
    %cst_120 = arith.constant dense<0.000000e+00> : vector<16xf32>
    %452 = vector.multi_reduction <add>, %451, %cst_120 [1] : vector<16x10xf32> to vector<16xf32>
    %453 = vector.shape_cast %452 : vector<16xf32> to vector<16x1xf32>
    %c0_121 = arith.constant 0 : index
    %c0_122 = arith.constant 0 : index
    %454 = vector.load %arg15[%c0_121, %c0_122] : memref<16x10xf32, #tpu.memory_space<vmem>>, vector<16x10xf32>
    %c0_123 = arith.constant 0 : index
    %c0_124 = arith.constant 0 : index
    %455 = vector.load %arg9[%c0_123, %c0_124] : memref<1x10xf32, #tpu.memory_space<vmem>>, vector<1x10xf32>
    %456 = vector.broadcast %455 : vector<1x10xf32> to vector<16x10xf32>
    %457 = arith.mulf %454, %456 : vector<16x10xf32>
    %cst_125 = arith.constant dense<0.000000e+00> : vector<16xf32>
    %458 = vector.multi_reduction <add>, %457, %cst_125 [1] : vector<16x10xf32> to vector<16xf32>
    %459 = vector.shape_cast %458 : vector<16xf32> to vector<16x1xf32>
    %460 = arith.addf %453, %459 : vector<16x1xf32>
    %c0_126 = arith.constant 0 : index
    %c0_127 = arith.constant 0 : index
    %461 = vector.load %arg10[%c0_126, %c0_127] : memref<1x1xf32, #tpu.memory_space<vmem>>, vector<1x1xf32>
    %462 = vector.broadcast %461 : vector<1x1xf32> to vector<16x1xf32>
    %463 = arith.addf %460, %462 : vector<16x1xf32>
    %464 = arith.negf %463 : vector<16x1xf32>
    %465 = math.exp %464 : vector<16x1xf32>
    %cst_128 = arith.constant 1.000000e+00 : f32
    %466 = vector.broadcast %cst_128 : f32 to vector<16x1xf32>
    %467 = arith.addf %466, %465 : vector<16x1xf32>
    %468 = arith.divf %466, %467 : vector<16x1xf32>
    %c0_129 = arith.constant 0 : index
    %c0_130 = arith.constant 0 : index
    %469 = vector.load %arg11[%c0_129, %c0_130] : memref<16x1xf32, #tpu.memory_space<vmem>>, vector<16x1xf32>
    tpu.vector_store %arg11[%c0_129, %c0_130], %468 {strides = array<i32>} : memref<16x1xf32, #tpu.memory_space<vmem>>, vector<16x1xf32>,
    return
  }
}

</mosaic_0001>

<bundles_post_ra>
// kernel: rnn_encoder_pallas.1
= control target key start
LH: loop header
LB: loop body
LE: loop exit
PB: predicated region body
PF: predicated region fallthrough
CT: control target
= control target key end

     0   :  { %s3777_s0 = inlined_call_operand.vmem [shape: f32[16,10], index: 0, kind: input, shape index: {}]   ;;  %s3778_s1 = inlined_call_operand.hbm [shape: f32[10,80], index: 1, kind: input, shape index: {}]   ;;  %s3779_s2 = inlined_call_operand.hbm [shape: f32[20,80], index: 2, kind: input, shape index: {}]   ;;  %s3780_s3 = inlined_call_operand.hbm [shape: f32[1,80], index: 3, kind: input, shape index: {}]   ;;  %s3781_s4 = inlined_call_operand.hbm [shape: f32[10,80], index: 4, kind: input, shape index: {}]   ;;  %s3782_s5 = inlined_call_operand.hbm [shape: f32[10,80], index: 5, kind: input, shape index: {}]   ;;  %s3783_s6 = inlined_call_operand.hbm [shape: f32[20,80], index: 6, kind: input, shape index: {}]   ;;  %s3784_s7 = inlined_call_operand.hbm [shape: f32[1,80], index: 7, kind: input, shape index: {}]   ;;  %s3785_s8 = inlined_call_operand.hbm [shape: f32[1,10], index: 8, kind: input, shape index: {}]   ;;  %s3786_s9 = inlined_call_operand.hbm [shape: f32[1,10], index: 9, kind: input, shape index: {}]   ;;  %s3787_s10 = inlined_call_operand.<no memory space> [shape: f32[1,1], index: 10, kind: input, shape index: {}]   ;;  %s3788_s11 = inlined_call_operand.vmem [shape: f32[16,1], index: 11, kind: output, shape index: {}]  }
   0x1   :  { %v16_v0 = vstv %s3787_s10 }
   0x2   :  { %17 = vst [vmem:[#allocation6] sm:$0x1] %v16_v0 }
   0x3   :  { %18 = vsyncpa [#allocation8], 0 }
   0x4   :  { %19 = vsyncpa [#allocation10], 0 }
   0x5   :  { %20 = vsyncpa [#allocation13], 0 }
   0x6   :  { %21 = vsyncpa [#allocation16], 0 }
   0x7   :  { %22 = vsyncpa [#allocation19], 0  ;;  %s3122_s19 = smov [#allocation9]   ;;  %s3123_s21 = smov [#allocation12]  }
   0x8   :  { %s42_s20 = sshll.u32 %s3122_s19, 4  ;;  %s64_s22 = sshll.u32 %s3123_s21, 4  ;;  %s43_s20 = int_to_ptr.vmem [resolvable:$true] %s42_s20  ;;  %s3205_s22 = int_to_ptr.vmem [resolvable:$true] %s64_s22 }
   0x9   :  { %s2914_s25 = scalar_lea.hbm %s3779_s2, 384 }
   0xa   :  { %p2915_p0 = scmp.ne.s32.totalorder %s3779_s2, %s2914_s25  ;;  %p2918_p1 = scmp.lt.u32.totalorder %s2914_s25, %s3779_s2 }
   0xc   :  { %p2920_p2 = pnand %p2918_p1, %p2915_p0 }
   0xe   :  { %2923 = shalt.err (!%p2920_p2)
}
   0xf   :  { %s2924_s29 = scalar_lea.vmem %s43_s20, 384  ;;  %p2929_p4 = scmp.lt.s32.totalorder %s43_s20, %s43_s20 }
  0x10   :  { %p2925_p3 = scmp.ne.s32.totalorder %s43_s20, %s2924_s29  ;;  %p2930_p5 = scmp.lt.s32.totalorder %s2924_s29, %s2924_s29 }
  0x12   :  { %p2931_p6 = por %p2930_p5, %p2929_p4 }
  0x14   :  { %p2932_p7 = pnand %p2931_p6, %p2925_p3 }
  0x16   :  { %2935 = shalt.err (!%p2932_p7)
}
  0x17   :  { %s3124_s30 = smov 128   ;;  %s3125_s12 = smov 8  }
  0x18   :  { %48 = dma.hbm_to_vmem [thread:$0]  %s3779_s2, 384, %s43_s20, [#allocation10], %s3124_s30, %s3124_s30, %s3125_s12  }
  0x19   :  { %s2936_s17 = scalar_lea.hbm %s3781_s4, 256 }
  0x1a   :  { %p2937_p8 = scmp.ne.s32.totalorder %s3781_s4, %s2936_s17  ;;  %p2940_p9 = scmp.lt.u32.totalorder %s2936_s17, %s3781_s4 }
  0x1c   :  { %p2942_p10 = pnand %p2940_p9, %p2937_p8 }
  0x1e   :  { %2945 = shalt.err (!%p2942_p10)
}
  0x1f   :  { %s2946_s24 = scalar_lea.vmem %s3205_s22, 256  ;;  %p2951_p12 = scmp.lt.s32.totalorder %s3205_s22, %s3205_s22 }
  0x20   :  { %p2947_p11 = scmp.ne.s32.totalorder %s3205_s22, %s2946_s24  ;;  %p2952_p13 = scmp.lt.s32.totalorder %s2946_s24, %s2946_s24 }
  0x22   :  { %p2953_p0 = por %p2952_p13, %p2951_p12 }
  0x24   :  { %p2954_p1 = pnand %p2953_p0, %p2947_p11 }
  0x26   :  { %2957 = shalt.err (!%p2954_p1)
}
  0x27   :  { %70 = dma.hbm_to_vmem [thread:$0]  %s3781_s4, 256, %s3205_s22, [#allocation13], %s3124_s30, %s3124_s30, %s3125_s12  }
  0x28   :  { %s3126_s25 = smov [#allocation15]   ;;  %s3127_s27 = smov [#allocation18]  }
  0x29   :  { %s88_s26 = sshll.u32 %s3126_s25, 4  ;;  %s111_s10 = sshll.u32 %s3127_s27, 4  ;;  %s89_s26 = int_to_ptr.vmem [resolvable:$true] %s88_s26  ;;  %s112_s10 = int_to_ptr.vmem [resolvable:$true] %s111_s10 }
  0x2a   :  { %s2958_s13 = scalar_lea.hbm %s3783_s6, 384 }
  0x2b   :  { %p2959_p2 = scmp.ne.s32.totalorder %s3783_s6, %s2958_s13  ;;  %p2962_p3 = scmp.lt.u32.totalorder %s2958_s13, %s3783_s6 }
  0x2d   :  { %p2964_p4 = pnand %p2962_p3, %p2959_p2 }
  0x2f   :  { %2967 = shalt.err (!%p2964_p4)
}
  0x30   :  { %s2968_s4 = scalar_lea.vmem %s89_s26, 384  ;;  %p2973_p6 = scmp.lt.s32.totalorder %s89_s26, %s89_s26 }
  0x31   :  { %p2969_p5 = scmp.ne.s32.totalorder %s89_s26, %s2968_s4  ;;  %p2974_p7 = scmp.lt.s32.totalorder %s2968_s4, %s2968_s4 }
  0x33   :  { %p2975_p8 = por %p2974_p7, %p2973_p6 }
  0x35   :  { %p2976_p9 = pnand %p2975_p8, %p2969_p5 }
  0x37   :  { %2979 = shalt.err (!%p2976_p9)
}
  0x38   :  { %94 = dma.hbm_to_vmem [thread:$0]  %s3783_s6, 384, %s89_s26, [#allocation16], %s3124_s30, %s3124_s30, %s3125_s12  }
  0x39   :  { %s2980_s23 = scalar_lea.hbm %s3785_s8, 16 }
  0x3a   :  { %p2981_p10 = scmp.ne.s32.totalorder %s3785_s8, %s2980_s23  ;;  %p2984_p11 = scmp.lt.u32.totalorder %s2980_s23, %s3785_s8 }
  0x3c   :  { %p2986_p12 = pnand %p2984_p11, %p2981_p10 }
  0x3e   :  { %2989 = shalt.err (!%p2986_p12)
}
  0x3f   :  { %s2990_s27 = scalar_lea.vmem %s112_s10, 16  ;;  %s2994_s28 = scalar_lea.vmem %s112_s10, 32 }
  0x40   :  { %p2991_p13 = scmp.ne.s32.totalorder %s112_s10, %s2990_s27  ;;  %p2995_p0 = scmp.lt.s32.totalorder %s112_s10, %s112_s10 }
  0x41   :  { %p2996_p1 = scmp.lt.s32.totalorder %s2994_s28, %s2990_s27 }
  0x43   :  { %p2997_p2 = por %p2996_p1, %p2995_p0 }
  0x45   :  { %p2998_p3 = pnand %p2997_p2, %p2991_p13 }
  0x47   :  { %3001 = shalt.err (!%p2998_p3)
}
  0x48   :  { %114 = dma.hbm_to_vmem [thread:$0]  %s3785_s8, 16, %s112_s10, [#allocation19]  }
  0x49   :  { %s3128_s29 = smov [#allocation7]   ;;  %s3129_s14 = smov [#allocation11]  }
  0x4a   :  { %s30_s13 = sshll.u32 %s3128_s29, 4  ;;  %s55_s15 = sshll.u32 %s3129_s14, 4  ;;  %s31_s13 = int_to_ptr.vmem [resolvable:$true] %s30_s13  ;;  %s56_s15 = int_to_ptr.vmem [resolvable:$true] %s55_s15 }
  0x4b   :  { %s3002_s4 = scalar_lea.hbm %s3778_s1, 256 }
  0x4c   :  { %p3003_p4 = scmp.ne.s32.totalorder %s3778_s1, %s3002_s4  ;;  %p3006_p5 = scmp.lt.u32.totalorder %s3002_s4, %s3778_s1 }
  0x4e   :  { %p3008_p6 = pnand %p3006_p5, %p3003_p4 }
  0x50   :  { %3011 = shalt.err (!%p3008_p6)
}
  0x51   :  { %s3012_s8 = scalar_lea.vmem %s31_s13, 256  ;;  %p3017_p8 = scmp.lt.s32.totalorder %s31_s13, %s31_s13 }
  0x52   :  { %p3013_p7 = scmp.ne.s32.totalorder %s31_s13, %s3012_s8  ;;  %p3018_p9 = scmp.lt.s32.totalorder %s3012_s8, %s3012_s8 }
  0x54   :  { %p3019_p10 = por %p3018_p9, %p3017_p8 }
  0x56   :  { %p3020_p11 = pnand %p3019_p10, %p3013_p7 }
  0x58   :  { %3023 = shalt.err (!%p3020_p11)
}
  0x59   :  { %36 = dma.hbm_to_vmem [thread:$0]  %s3778_s1, 256, %s31_s13, [#allocation8], %s3124_s30, %s3124_s30, %s3125_s12  }
  0x5a   :  { %s3024_s20 = scalar_lea.hbm %s3780_s3, 16 }
  0x5b   :  { %p3025_p12 = scmp.ne.s32.totalorder %s3780_s3, %s3024_s20  ;;  %p3028_p13 = scmp.lt.u32.totalorder %s3024_s20, %s3780_s3 }
  0x5d   :  { %p3030_p0 = pnand %p3028_p13, %p3025_p12 }
  0x5f   :  { %3033 = shalt.err (!%p3030_p0)
}
  0x60   :  { %s3034_s26 = scalar_lea.vmem %s56_s15, 16  ;;  %s3038_s29 = scalar_lea.vmem %s56_s15, 32 }
  0x61   :  { %p3035_p1 = scmp.ne.s32.totalorder %s56_s15, %s3034_s26  ;;  %p3039_p2 = scmp.lt.s32.totalorder %s56_s15, %s56_s15 }
  0x62   :  { %p3040_p3 = scmp.lt.s32.totalorder %s3038_s29, %s3034_s26 }
  0x64   :  { %p3041_p4 = por %p3040_p3, %p3039_p2 }
  0x66   :  { %p3042_p5 = pnand %p3041_p4, %p3035_p1 }
  0x68   :  { %3045 = shalt.err (!%p3042_p5)
}
  0x69   :  { %58 = dma.hbm_to_vmem [thread:$0]  %s3780_s3, 16, %s56_s15, [#allocation10]  }
  0x6a   :  { %s3130_s14 = smov [#allocation14]   ;;  %s3131_s17 = smov [#allocation17]  }
  0x6b   :  { %s76_s16 = sshll.u32 %s3130_s14, 4  ;;  %s101_s4 = sshll.u32 %s3131_s17, 4  ;;  %s77_s16 = int_to_ptr.vmem [resolvable:$true] %s76_s16  ;;  %s102_s4 = int_to_ptr.vmem [resolvable:$true] %s101_s4 }
  0x6c   :  { %s3046_s19 = scalar_lea.hbm %s3782_s5, 256 }
  0x6d   :  { %p3047_p6 = scmp.ne.s32.totalorder %s3782_s5, %s3046_s19  ;;  %p3050_p7 = scmp.lt.u32.totalorder %s3046_s19, %s3782_s5 }
  0x6f   :  { %p3052_p8 = pnand %p3050_p7, %p3047_p6 }
  0x71   :  { %3055 = shalt.err (!%p3052_p8)
}
  0x72   :  { %s3056_s3 = scalar_lea.vmem %s77_s16, 256  ;;  %p3061_p10 = scmp.lt.s32.totalorder %s77_s16, %s77_s16 }
  0x73   :  { %p3057_p9 = scmp.ne.s32.totalorder %s77_s16, %s3056_s3  ;;  %p3062_p11 = scmp.lt.s32.totalorder %s3056_s3, %s3056_s3 }
  0x75   :  { %p3063_p12 = por %p3062_p11, %p3061_p10 }
  0x77   :  { %p3064_p13 = pnand %p3063_p12, %p3057_p9 }
  0x79   :  { %3067 = shalt.err (!%p3064_p13)
}
  0x7a   :  { %82 = dma.hbm_to_vmem [thread:$0]  %s3782_s5, 256, %s77_s16, [#allocation13], %s3124_s30, %s3124_s30, %s3125_s12  }
  0x7b   :  { %s3068_s25 = scalar_lea.hbm %s3784_s7, 16 }
  0x7c   :  { %p3069_p0 = scmp.ne.s32.totalorder %s3784_s7, %s3068_s25  ;;  %p3072_p1 = scmp.lt.u32.totalorder %s3068_s25, %s3784_s7 }
  0x7e   :  { %p3074_p2 = pnand %p3072_p1, %p3069_p0 }
  0x80   :  { %3077 = shalt.err (!%p3074_p2)
}
  0x81   :  { %s3078_s29 = scalar_lea.vmem %s102_s4, 16  ;;  %s3082_s1 = scalar_lea.vmem %s102_s4, 32 }
  0x82   :  { %p3079_p3 = scmp.ne.s32.totalorder %s102_s4, %s3078_s29  ;;  %p3083_p4 = scmp.lt.s32.totalorder %s102_s4, %s102_s4 }
  0x83   :  { %p3084_p5 = scmp.lt.s32.totalorder %s3082_s1, %s3078_s29 }
  0x85   :  { %p3085_p6 = por %p3084_p5, %p3083_p4 }
  0x87   :  { %p3086_p7 = pnand %p3085_p6, %p3079_p3 }
  0x89   :  { %3089 = shalt.err (!%p3086_p7)
}
  0x8a   :  { %104 = dma.hbm_to_vmem [thread:$0]  %s3784_s7, 16, %s102_s4, [#allocation16]  }
  0x8b   :  { %s3132_s12 = smov [#allocation20]   ;;  %s3090_s17 = scalar_lea.hbm %s3786_s9, 16 }
  0x8c   :  { %s121_s13 = sshll.u32 %s3132_s12, 4  ;;  %p3091_p8 = scmp.ne.s32.totalorder %s3786_s9, %s3090_s17  ;;  %s122_s13 = int_to_ptr.vmem [resolvable:$true] %s121_s13 }
  0x8d   :  { %p3094_p9 = scmp.lt.u32.totalorder %s3090_s17, %s3786_s9 }
  0x8f   :  { %p3096_p10 = pnand %p3094_p9, %p3091_p8 }
  0x91   :  { %3099 = shalt.err (!%p3096_p10)
}
  0x92   :  { %s3100_s8 = scalar_lea.vmem %s122_s13, 16  ;;  %s3104_s7 = scalar_lea.vmem %s122_s13, 32 }
  0x93   :  { %p3101_p11 = scmp.ne.s32.totalorder %s122_s13, %s3100_s8  ;;  %p3105_p12 = scmp.lt.s32.totalorder %s122_s13, %s122_s13 }
  0x94   :  { %p3106_p13 = scmp.lt.s32.totalorder %s3104_s7, %s3100_s8 }
  0x96   :  { %p3107_p0 = por %p3106_p13, %p3105_p12 }
  0x98   :  { %p3108_p1 = pnand %p3107_p0, %p3101_p11 }
  0x9a   :  { %3111 = shalt.err (!%p3108_p1)
}
  0x9b   :  { %124 = dma.hbm_to_vmem [thread:$0]  %s3786_s9, 16, %s122_s13, [#allocation19]  }
  0x9c   :  { %3112 = dma.done.wait [#allocation8], 256  }
  0x9d   :  { %3113 = vsyncadd [#allocation8], 4294967040 }
  0x9e   :  { %3114 = dma.done.wait [#allocation10], 400  }
  0x9f   :  { %3115 = vsyncadd [#allocation10], 4294966896 }
  0xa0   :  { %3116 = dma.done.wait [#allocation13], 512  }
  0xa1   :  { %3117 = vsyncadd [#allocation13], 4294966784 }
  0xa2   :  { %3118 = dma.done.wait [#allocation16], 400  }
  0xa3   :  { %3119 = vsyncadd [#allocation16], 4294966896 }
  0xa4   :  { %3120 = dma.done.wait [#allocation19], 32  }
  0xa5   :  { %3121 = vsyncadd [#allocation19], 4294967264  ;;  %v3133_v1 = vmov 0.0|0.0   ;;  %vm3134_vm0 = vmmov 0   ;;  %v3135_v2 = vmov 0.0   ;;  %vm189_vm1 = vcmask 1041408  }
  0xa6   :  { %2696 = vmatprep.subr.bf16.mxu1 %v3133_v1  ;;  %2538 = vmatprep.mubr.msk.f32.mxu1 %vm3134_vm0, %v3135_v2  ;;  %vm3789_vm2 = vcmask 80896   ;;  %vm3136_vm3 = vmmov 1   ;;  %v173_v4 = vld [vmem:[#allocation7] sm:$0xff]  ;;  %v174_v5 = vld [vmem:[#allocation7 + $0x8] sm:$0x3]  ;;  %v268_v8 = vld [vmem:[#allocation9] sm:$0xff]  ;;  %v154_v13 = vlaneseq }
  0xa7   :  { %vm3338_vm4 = vmpackc.low %vm189_vm1, %vm3136_vm3  ;;  %v171_v6 = vld [vmem:[%s3777_s0] sm:$0xff]  ;;  %v2690_v7 = vpack.c.bf16 %v174_v5, %v173_v4  ;;  %v172_v11 = vld [vmem:[%s3777_s0 + $0x8] sm:$0xff]  ;;  %vm279_vm5 = vcmask 1043456   ;;  %s3137_s0 = smov 88   ;;  %s3138_s24 = smov 20  }
  0xa8   :  { %2529 = vmatprep.mubr.msk.f32.mxu0 %vm3789_vm2, %v171_v6  ;;  %v269_v9 = vld [vmem:[#allocation9 + $0x8] sm:$0xff]  ;;  %v3357_v12 = vld [vmem:[#allocation9 + $0x10] sm:$0xf]  ;;  %v155_v14 = vand.u32 127, %v154_v13  ;;  %v2387_v15 = vld [vmem:[#allocation11] ss:$0 sm:$0xff] }
  0xa9   :  { %v3346_v10 = vpack.c.bf16 %v269_v9, %v268_v8  ;;  %2692 = vmatprep.subr.msk.bf16.mxu0 %vm3338_vm4, %v2690_v7  ;;  %s3139_s2 = smov 40   ;;  %s3140_s20 = smov 68  }
  0xaa   :  { %2695 = vmatpush3.bf16.msk.msra.mxu0 %vm3338_vm4, %v2690_v7  ;;  %vm160_vm6 = vcmp.ge.s32.totalorder %v155_v14, 20  ;;  %vm161_vm7 = vcmp.lt.s32.totalorder %v155_v14, 30  ;;  %vm159_vm8 = vcmp.lt.s32.totalorder %v155_v14, 10  ;;  %vm156_vm10 = vcmp.ge.s32.totalorder %v155_v14, 40  ;;  %s3141_s25 = smov 58  }
  0xab   :  { %2698 = vmatpush3.bf16.msra.mxu1 %v3346_v10  ;;  %2699 = vmatprep.subr.bf16.mxu0 %v3133_v1  ;;  %vm162_vm9 = vmand %vm160_vm6, %vm161_vm7  ;;  %vm164_vm11 = vcmp.lt.s32.totalorder %v155_v14, 50  ;;  %vm167_vm14 = vcmp.ge.s32.totalorder %v155_v14, 60  ;;  %vm168_vm15 = vcmp.lt.s32.totalorder %v155_v14, 70  ;;  %vm157_vm6 = vcmp.lt.s32.totalorder %v155_v14, 60 }
  0xac   :  { %2536 = vmatprep.subr.mxu1 %v3135_v2  ;;  %vm163_vm12 = vmor %vm159_vm8, %vm162_vm9  ;;  %vm383_vm8 = vcmask 74752   ;;  %vm275_vm9 = vcmask 162816  }
  0xad   :  { %2530 = vmatmul.mubr.msk.f32.vlgmr.msra.gmra.mrb[0].mxu0 %vm3789_vm2, %v172_v11  ;;  %vm165_vm13 = vmand %vm156_vm10, %vm164_vm11  ;;  %vm500_vm11 = vcmask 76802  }
  0xae   :  { %2701 = vmatpush3.bf16.msra.mxu0 %v3346_v10  ;;  %2547 = vmatprep.mubr.msk.f32.mxu0 %vm3134_vm0, %v3135_v2  ;;  %vm166_vm1 = vmor %vm163_vm12, %vm165_vm13  ;;  %vm734_vm12 = vcmask 80902   ;;  %vm3796_vm13 = vcmask 80896  }
  0xaf   :  { %2537 = vmatpush3.msk.msra.mxu1 %vm279_vm5, %v3357_v12  ;;  %2545 = vmatprep.subr.mxu0 %v3135_v2  ;;  %vm169_vm3 = vmand %vm167_vm14, %vm168_vm15 }
  0xb0   :  { %2539 = vmatmul.mubr.f32.vlgmr.msra.gmra.mrb[0].mxu1 %v3135_v2  ;;  %2702 = vmatprep.subr.bf16.mxu1 %v3133_v1  ;;  %vm3380_vm2 = vmor %vm166_vm1, %vm169_vm3  ;;  %vm2375_vm3 = vcmask 7168  }
  0xb1   :  { %2704 = vmatpush3.bf16.msra.mxu1 %v3346_v10  ;;  %2556 = vmatprep.mubr.msk.f32.mxu1 %vm3134_vm0, %v3135_v2  ;;  %vm3402_vm7 = vmand %vm156_vm10, %vm157_vm6  ;;  %vm617_vm10 = vcmask 78852  }
  0xb2   :  { %2546 = vmatpush3.msk.msra.mxu0 %vm279_vm5, %v3357_v12  ;;  %2554 = vmatprep.subr.mxu1 %v3135_v2  ;;  %vm3797_vm14 = vmmov %vm3796_vm13 }
  0xb3   :  { %2705 = vmatprep.subr.bf16.mxu0 %v3133_v1  ;;  %vm3798_vm15 = vmmov %vm3796_vm13 }
  0xb4   :  { %vm3799_vm1 = vmmov %vm3796_vm13 }
  0xb5   :  { %2555 = vmatpush3.msk.msra.mxu1 %vm279_vm5, %v3357_v12 }
  0xb6   :  { %2708 = vmatprep.subr.bf16.mxu1 %v3133_v1 }
 0x180   :  { %v2531_v16 = vpop.f32.mrb[0].mxu0 }
 0x181   :  { %v265_v17 = vadd.f32 %v2531_v16, %v2387_v15  ;;  %v259_v18 = vpop.f32.mrb[1].mxu0 }
 0x182   :  { %v260_v19 = vadd.f32 %v2387_v15, %v259_v18 }
 0x183   :  { %v349_v21 = vpop.f32.mrb[0].mxu1  ;;  %v272_v22 = vrot.slane %v265_v17, 6  ;;  %v389_v24 = vrot.slane %v265_v17, 2 }
 0x184   :  { %v2540_v23 = vpop.f32.mrb[1].mxu1  ;;  %v741_v25 = vrot.slane %v260_v19, 6  ;;  %v857_v26 = vrot.slane %v260_v19, 2 }
 0x185   :  { %v3386_v27 = vsel %vm3380_vm2, %v260_v19, %v272_v22  ;;  %v3390_v28 = vsel %vm3380_vm2, %v260_v19, %v389_v24 }
 0x186   :  { %v353_v29 = vadd.f32 %v349_v21, %v3386_v27  ;;  %v3395_v30 = vsel %vm3380_vm2, %v265_v17, %v741_v25  ;;  %v3399_v31 = vsel %vm3380_vm2, %v265_v17, %v857_v26 }
 0x188   :  { %v2392_v32 = vmul.f32 -1.442695, %v353_v29 }
 0x18a   :  { %2778 = vpow2.f32 %v2392_v32 }
 0x18b   :  { %2780 = vtanh.f32 %v353_v29 }
 0x194   :  { %v2779_v33 = vpop.eup %2778 }
 0x195   :  { %v358_v34 = vadd.f32 1.0, %v2779_v33  ;;  %v2781_v36 = vpop.eup %2780 }
 0x197   :  { %2782 = vrcp.f32 %v358_v34 }
 0x1a1   :  { %v2783_v37 = vpop.eup %2782 }
 0x1a2   :  { %v361_v38 = vsel %vm3402_vm7, %v2781_v36, %v2783_v37 }
 0x1a3   :  { %364 = vrot.lane.b32.xlu0 %v361_v38, %s3137_s0  ;;  %v362_v41 = vmul.f32 0.0, %v361_v38 }
 0x215   :  { %v365_v39 = vpop.permute.xlu0 %364 }
 0x216   :  { %v367_v40 = vmul.f32 %v365_v39, %v361_v38 }
 0x218   :  { %369 = vrot.lane.b32.xlu0 %v367_v40, %s3138_s24 }
 0x28a   :  { %v370_v42 = vpop.permute.xlu0 %369 }
 0x28b   :  { %v372_v43 = vadd.f32 %v370_v42, %v362_v41 }
 0x28d   :  { %2784 = vtanh.f32 %v372_v43  ;;  %v477_v60 = vrot.slane %v372_v43, 6 }
 0x297   :  { %v2785_v44 = vpop.eup %2784 }
 0x298   :  { %375 = vrot.lane.b32.xlu1 %v2785_v44, %s3139_s2 }
 0x30a   :  { %v376_v45 = vpop.permute.xlu1 %375 }
 0x30b   :  { %v3411_v46 = vmul.f32 %v376_v45, %v361_v38 }
 0x30d   :  { %380 = vrot.lane.b32.xlu1 %v3411_v46, %s3140_s20 }
 0x37f   :  { %v381_v47 = vpop.permute.xlu1 %380 }
 0x380   :  { %384 = vst.msk [vmem:[#allocation2] sm:$0x3] %vm383_vm8, %v381_v47  ;;  %2548 = vmatmul.mubr.msk.f32.vlgmr.msra.gmra.mrb[2].mxu0 %vm275_vm9, %v381_v47 }
 0x381   :  { %2707 = vmatpush3.bf16.msra.mxu0 %v3346_v10  ;;  %2565 = vmatprep.mubr.msk.f32.mxu0 %vm3134_vm0, %v3135_v2 }
 0x382   :  { %2563 = vmatprep.subr.mxu0 %v3135_v2 }
 0x385   :  { %2564 = vmatpush3.msk.msra.mxu0 %vm279_vm5, %v3357_v12 }
 0x386   :  { %2711 = vmatprep.subr.bf16.mxu0 %v3133_v1 }
 0x453   :  { %v460_v48 = vpop.f32.mrb[2].mxu0 }
 0x454   :  { %v465_v49 = vrot.slane %v460_v48, 6  ;;  %v2549_v50 = vpop.f32.mrb[3].mxu0 }
 0x456   :  { %v467_v51 = vadd.f32 %v465_v49, %v3390_v28 }
 0x458   :  { %v2395_v52 = vmul.f32 -1.442695, %v467_v51 }
 0x45a   :  { %2786 = vpow2.f32 %v2395_v52 }
 0x45b   :  { %2788 = vtanh.f32 %v467_v51 }
 0x464   :  { %v2787_v53 = vpop.eup %2786 }
 0x465   :  { %v472_v54 = vadd.f32 1.0, %v2787_v53  ;;  %v2789_v55 = vpop.eup %2788 }
 0x467   :  { %2790 = vrcp.f32 %v472_v54 }
 0x471   :  { %v2791_v56 = vpop.eup %2790 }
 0x472   :  { %v475_v57 = vsel %vm3402_vm7, %v2789_v55, %v2791_v56 }
 0x473   :  { %481 = vrot.lane.b32.xlu0 %v475_v57, %s3137_s0  ;;  %v479_v61 = vmul.f32 %v477_v60, %v475_v57 }
 0x4e5   :  { %v482_v58 = vpop.permute.xlu0 %481 }
 0x4e6   :  { %v484_v59 = vmul.f32 %v482_v58, %v475_v57 }
 0x4e8   :  { %486 = vrot.lane.b32.xlu1 %v484_v59, %s3138_s24 }
 0x55a   :  { %v487_v62 = vpop.permute.xlu1 %486 }
 0x55b   :  { %v489_v63 = vadd.f32 %v487_v62, %v479_v61 }
 0x55d   :  { %2792 = vtanh.f32 %v489_v63  ;;  %v594_v23 = vrot.slane %v489_v63, 6 }
 0x567   :  { %v2793_v0 = vpop.eup %2792 }
 0x568   :  { %492 = vrot.lane.b32.xlu0 %v2793_v0, %s3139_s2 }
 0x5da   :  { %v493_v4 = vpop.permute.xlu0 %492 }
 0x5db   :  { %v3430_v5 = vmul.f32 %v493_v4, %v475_v57 }
 0x5dd   :  { %v506_v6 = vrot.slane %v3430_v5, 2 }
 0x5df   :  { %507 = vrot.lane.b32.xlu1 %v506_v6, %s3140_s20 }
 0x651   :  { %v508_v7 = vpop.permute.xlu1 %507 }
 0x652   :  { %2557 = vmatmul.mubr.msk.f32.vlgmr.msra.gmra.mrb[2].mxu1 %vm275_vm9, %v508_v7 }
 0x653   :  { %2710 = vmatpush3.bf16.msra.mxu1 %v3346_v10  ;;  %2574 = vmatprep.mubr.msk.f32.mxu1 %vm3134_vm0, %v3135_v2 }
 0x654   :  { %2572 = vmatprep.subr.mxu1 %v3135_v2 }
 0x657   :  { %2573 = vmatpush3.msk.msra.mxu1 %vm279_vm5, %v3357_v12 }
 0x658   :  { %2714 = vmatprep.subr.bf16.mxu1 %v3133_v1 }
 0x725   :  { %v577_v8 = vpop.f32.mrb[2].mxu1 }
 0x726   :  { %v582_v9 = vrot.slane %v577_v8, 4  ;;  %v2558_v11 = vpop.f32.mrb[3].mxu1 }
 0x728   :  { %v584_v13 = vadd.f32 %v582_v9, %v3386_v27 }
 0x72a   :  { %v2398_v14 = vmul.f32 -1.442695, %v584_v13 }
 0x72c   :  { %2794 = vpow2.f32 %v2398_v14 }
 0x72d   :  { %2796 = vtanh.f32 %v584_v13 }
 0x736   :  { %v2795_v15 = vpop.eup %2794 }
 0x737   :  { %v589_v16 = vadd.f32 1.0, %v2795_v15  ;;  %v2797_v17 = vpop.eup %2796 }
 0x739   :  { %2798 = vrcp.f32 %v589_v16 }
 0x743   :  { %v2799_v18 = vpop.eup %2798 }
 0x744   :  { %v592_v19 = vsel %vm3402_vm7, %v2797_v17, %v2799_v18 }
 0x745   :  { %598 = vrot.lane.b32.xlu0 %v592_v19, %s3137_s0  ;;  %v596_v24 = vmul.f32 %v594_v23, %v592_v19 }
 0x7b7   :  { %v599_v21 = vpop.permute.xlu0 %598 }
 0x7b8   :  { %v601_v22 = vmul.f32 %v599_v21, %v592_v19 }
 0x7ba   :  { %603 = vrot.lane.b32.xlu1 %v601_v22, %s3138_s24 }
 0x82c   :  { %v604_v25 = vpop.permute.xlu1 %603 }
 0x82d   :  { %v606_v26 = vadd.f32 %v604_v25, %v596_v24 }
 0x82f   :  { %2800 = vtanh.f32 %v606_v26  ;;  %v711_v49 = vrot.slane %v606_v26, 6 }
 0x839   :  { %v2801_v27 = vpop.eup %2800 }
 0x83a   :  { %609 = vrot.lane.b32.xlu0 %v2801_v27, %s3139_s2 }
 0x8ac   :  { %v610_v29 = vpop.permute.xlu0 %609 }
 0x8ad   :  { %v3448_v32 = vmul.f32 %v610_v29, %v592_v19 }
 0x8af   :  { %v623_v33 = vrot.slane %v3448_v32, 4 }
 0x8b1   :  { %624 = vrot.lane.b32.xlu1 %v623_v33, %s3140_s20 }
 0x923   :  { %v625_v34 = vpop.permute.xlu1 %624 }
 0x924   :  { %2566 = vmatmul.mubr.msk.f32.vlgmr.msra.gmra.mrb[4].mxu0 %vm275_vm9, %v625_v34 }
 0x925   :  { %2713 = vmatpush3.bf16.msra.mxu0 %v3346_v10  ;;  %2583 = vmatprep.mubr.msk.f32.mxu0 %vm3134_vm0, %v3135_v2 }
 0x926   :  { %2581 = vmatprep.subr.mxu0 %v3135_v2 }
 0x929   :  { %2582 = vmatpush3.msk.msra.mxu0 %vm279_vm5, %v3357_v12 }
 0x92a   :  { %2717 = vmatprep.subr.bf16.mxu0 %v3133_v1 }
 0x9f7   :  { %v694_v36 = vpop.f32.mrb[4].mxu0 }
 0x9f8   :  { %v699_v37 = vrot.slane %v694_v36, 2  ;;  %v2567_v38 = vpop.f32.mrb[5].mxu0 }
 0x9fa   :  { %v701_v39 = vadd.f32 %v699_v37, %v3390_v28 }
 0x9fc   :  { %v2401_v40 = vmul.f32 -1.442695, %v701_v39 }
 0x9fe   :  { %2802 = vpow2.f32 %v2401_v40 }
 0x9ff   :  { %2804 = vtanh.f32 %v701_v39 }
 0xa08   :  { %v2803_v41 = vpop.eup %2802 }
 0xa09   :  { %v706_v42 = vadd.f32 1.0, %v2803_v41  ;;  %v2805_v43 = vpop.eup %2804 }
 0xa0b   :  { %2806 = vrcp.f32 %v706_v42 }
 0xa15   :  { %v2807_v44 = vpop.eup %2806 }
 0xa16   :  { %v709_v45 = vsel %vm3402_vm7, %v2805_v43, %v2807_v44 }
 0xa17   :  { %715 = vrot.lane.b32.xlu0 %v709_v45, %s3137_s0  ;;  %v713_v50 = vmul.f32 %v711_v49, %v709_v45 }
 0xa89   :  { %v716_v47 = vpop.permute.xlu0 %715 }
 0xa8a   :  { %v718_v48 = vmul.f32 %v716_v47, %v709_v45 }
 0xa8c   :  { %720 = vrot.lane.b32.xlu1 %v718_v48, %s3138_s24 }
 0xafe   :  { %v721_v28 = vpop.permute.xlu1 %720 }
 0xaff   :  { %v723_v51 = vadd.f32 %v721_v28, %v713_v50 }
 0xb01   :  { %2808 = vtanh.f32 %v723_v51  ;;  %v829_v8 = vrot.slane %v723_v51, 6 }
 0xb0b   :  { %v2809_v52 = vpop.eup %2808 }
 0xb0c   :  { %726 = vrot.lane.b32.xlu0 %v2809_v52, %s3139_s2 }
 0xb7e   :  { %v727_v53 = vpop.permute.xlu0 %726 }
 0xb7f   :  { %v3466_v54 = vmul.f32 %v727_v53, %v709_v45 }
 0xb81   :  { %v744_v55 = vrot.slane %v3466_v54, 6 }
 0xb83   :  { %745 = vrot.lane.b32.xlu1 %v744_v55, %s3140_s20 }
 0xbf5   :  { %v746_v56 = vpop.permute.xlu1 %745 }
 0xbf6   :  { %2575 = vmatmul.mubr.msk.f32.vlgmr.msra.gmra.mrb[4].mxu1 %vm275_vm9, %v746_v56 }
 0xbf7   :  { %2716 = vmatpush3.bf16.msra.mxu1 %v3346_v10  ;;  %2592 = vmatprep.mubr.msk.f32.mxu1 %vm3134_vm0, %v3135_v2 }
 0xbf8   :  { %2590 = vmatprep.subr.mxu1 %v3135_v2 }
 0xbfb   :  { %2591 = vmatpush3.msk.msra.mxu1 %vm279_vm5, %v3357_v12 }
 0xcc9   :  { %v815_v57 = vpop.f32.mrb[4].mxu1 }
 0xcca   :  { %v819_v58 = vadd.f32 %v815_v57, %v3395_v30  ;;  %v2576_v59 = vpop.f32.mrb[5].mxu1 }
 0xccc   :  { %v2404_v60 = vmul.f32 -1.442695, %v819_v58 }
 0xcce   :  { %2810 = vpow2.f32 %v2404_v60 }
 0xccf   :  { %2812 = vtanh.f32 %v819_v58 }
 0xcd8   :  { %v2811_v61 = vpop.eup %2810 }
 0xcd9   :  { %v824_v62 = vadd.f32 1.0, %v2811_v61  ;;  %v2813_v63 = vpop.eup %2812 }
 0xcdb   :  { %2814 = vrcp.f32 %v824_v62 }
 0xce5   :  { %v2815_v0 = vpop.eup %2814 }
 0xce6   :  { %v827_v4 = vsel %vm3402_vm7, %v2813_v63, %v2815_v0 }
 0xce7   :  { %833 = vrot.lane.b32.xlu0 %v827_v4, %s3137_s0  ;;  %v831_v9 = vmul.f32 %v829_v8, %v827_v4 }
 0xd59   :  { %v834_v6 = vpop.permute.xlu0 %833 }
 0xd5a   :  { %v836_v7 = vmul.f32 %v834_v6, %v827_v4 }
 0xd5c   :  { %838 = vrot.lane.b32.xlu1 %v836_v7, %s3138_s24 }
 0xdce   :  { %v839_v11 = vpop.permute.xlu1 %838 }
 0xdcf   :  { %v841_v13 = vadd.f32 %v839_v11, %v831_v9 }
 0xdd1   :  { %2816 = vtanh.f32 %v841_v13  ;;  %v945_v33 = vrot.slane %v841_v13, 6 }
 0xddb   :  { %v2817_v14 = vpop.eup %2816 }
 0xddc   :  { %844 = vrot.lane.b32.xlu0 %v2817_v14, %s3139_s2 }
 0xe4e   :  { %v845_v15 = vpop.permute.xlu0 %844 }
 0xe4f   :  { %v3483_v16 = vmul.f32 %v845_v15, %v827_v4 }
 0xe51   :  { %849 = vrot.lane.b32.xlu1 %v3483_v16, %s3140_s20 }
 0xec3   :  { %v850_v17 = vpop.permute.xlu1 %849 }
 0xec4   :  { %852 = vst.msk [vmem:[#allocation2 + $0x8] sm:$0x3] %vm383_vm8, %v850_v17  ;;  %2584 = vmatmul.mubr.msk.f32.vlgmr.msra.gmra.mrb[6].mxu0 %vm275_vm9, %v850_v17 }
 0xec5   :  { %2719 = vmatpush3.bf16.msra.mxu0 %v3346_v10  ;;  %2601 = vmatprep.mubr.msk.f32.mxu0 %vm3134_vm0, %v3135_v2 }
 0xec6   :  { %2599 = vmatprep.subr.mxu0 %v3135_v2 }
 0xec9   :  { %2600 = vmatpush3.msk.msra.mxu0 %vm279_vm5, %v3357_v12 }
 0xeca   :  { %2732 = vmatprep.subr.bf16.mxu0 %v3133_v1 }
 0xf97   :  { %v928_v18 = vpop.f32.mrb[6].mxu0 }
 0xf98   :  { %v933_v19 = vrot.slane %v928_v18, 6  ;;  %v2585_v21 = vpop.f32.mrb[7].mxu0 }
 0xf9a   :  { %v935_v22 = vadd.f32 %v933_v19, %v3399_v31 }
 0xf9c   :  { %v2407_v23 = vmul.f32 -1.442695, %v935_v22 }
 0xf9e   :  { %2818 = vpow2.f32 %v2407_v23 }
 0xf9f   :  { %2820 = vtanh.f32 %v935_v22 }
 0xfa8   :  { %v2819_v24 = vpop.eup %2818 }
 0xfa9   :  { %v940_v25 = vadd.f32 1.0, %v2819_v24  ;;  %v2821_v10 = vpop.eup %2820 }
 0xfab   :  { %2822 = vrcp.f32 %v940_v25 }
 0xfb5   :  { %v2823_v26 = vpop.eup %2822 }
 0xfb6   :  { %v943_v27 = vsel %vm3402_vm7, %v2821_v10, %v2823_v26 }
 0xfb7   :  { %949 = vrot.lane.b32.xlu0 %v943_v27, %s3137_s0  ;;  %v947_v34 = vmul.f32 %v945_v33, %v943_v27 }
0x1029   :  { %v950_v12 = vpop.permute.xlu0 %949 }
0x102a   :  { %v952_v29 = vmul.f32 %v950_v12, %v943_v27  ;;  %v1211_v12 = vld [vmem:[#allocation14] sm:$0xff] }
0x102c   :  { %954 = vrot.lane.b32.xlu1 %v952_v29, %s3138_s24  ;;  %v1212_v29 = vld [vmem:[#allocation14 + $0x8] sm:$0x3] }
0x102d   :  { %v2720_v33 = vpack.c.bf16 %v1212_v29, %v1211_v12 }
0x102f   :  { %2722 = vmatprep.subr.msk.bf16.mxu1 %vm3338_vm4, %v2720_v33 }
0x109e   :  { %v955_v36 = vpop.permute.xlu1 %954 }
0x109f   :  { %v957_v37 = vadd.f32 %v955_v36, %v947_v34  ;;  %v1208_v34 = vld [vmem:[#allocation12 + $0x8] sm:$0x3] }
0x10a1   :  { %2824 = vtanh.f32 %v957_v37  ;;  %v1061_v56 = vrot.slane %v957_v37, 6 }
0x10ab   :  { %v2825_v38 = vpop.eup %2824 }
0x10ac   :  { %960 = vrot.lane.b32.xlu0 %v2825_v38, %s3139_s2 }
0x111e   :  { %v961_v39 = vpop.permute.xlu0 %960 }
0x111f   :  { %v3502_v40 = vmul.f32 %v961_v39, %v943_v27  ;;  %v1391_v39 = vld [vmem:[#allocation15 + $0x8] sm:$0xff] }
0x1121   :  { %v973_v41 = vrot.slane %v3502_v40, 2 }
0x1123   :  { %974 = vrot.lane.b32.xlu1 %v973_v41, %s3140_s20 }
0x1195   :  { %v975_v42 = vpop.permute.xlu1 %974 }
0x1196   :  { %2593 = vmatmul.mubr.msk.f32.vlgmr.msra.gmra.mrb[6].mxu1 %vm275_vm9, %v975_v42 }
0x1197   :  { %2725 = vmatpush3.bf16.msk.msra.mxu1 %vm3338_vm4, %v2720_v33 }
0x1269   :  { %v1044_v43 = vpop.f32.mrb[6].mxu1 }
0x126a   :  { %v1049_v44 = vrot.slane %v1044_v43, 4  ;;  %v2594_v45 = vpop.f32.mrb[7].mxu1 }
0x126c   :  { %v1051_v47 = vadd.f32 %v1049_v44, %v3395_v30  ;;  %v3563_v44 = vld [vmem:[#allocation15 + $0x10] sm:$0xf] }
0x126e   :  { %v2410_v48 = vmul.f32 -1.442695, %v1051_v47 }
0x1270   :  { %2826 = vpow2.f32 %v2410_v48 }
0x1271   :  { %2828 = vtanh.f32 %v1051_v47 }
0x127a   :  { %v2827_v49 = vpop.eup %2826 }
0x127b   :  { %v1056_v50 = vadd.f32 1.0, %v2827_v49  ;;  %v2829_v28 = vpop.eup %2828 }
0x127d   :  { %2830 = vrcp.f32 %v1056_v50 }
0x1287   :  { %v2831_v51 = vpop.eup %2830 }
0x1288   :  { %v1059_v52 = vsel %vm3402_vm7, %v2829_v28, %v2831_v51 }
0x1289   :  { %1065 = vrot.lane.b32.xlu0 %v1059_v52, %s3137_s0  ;;  %v1063_v57 = vmul.f32 %v1061_v56, %v1059_v52 }
0x12fb   :  { %v1066_v53 = vpop.permute.xlu0 %1065 }
0x12fc   :  { %v1068_v55 = vmul.f32 %v1066_v53, %v1059_v52  ;;  %v2420_v53 = vld [vmem:[#allocation17] ss:$0 sm:$0xff] }
0x12fe   :  { %1070 = vrot.lane.b32.xlu1 %v1068_v55, %s3138_s24 }
0x1370   :  { %v1071_v30 = vpop.permute.xlu1 %1070 }
0x1371   :  { %v1073_v58 = vadd.f32 %v1071_v30, %v1063_v57 }
0x1373   :  { %2832 = vtanh.f32 %v1073_v58 }
0x137d   :  { %v2833_v59 = vpop.eup %2832 }
0x137e   :  { %1076 = vrot.lane.b32.xlu0 %v2833_v59, %s3139_s2 }
0x13f0   :  { %v1077_v60 = vpop.permute.xlu0 %1076 }
0x13f1   :  { %v1079_v61 = vmul.f32 %v1077_v60, %v1059_v52 }
0x13f3   :  { %v1089_v62 = vrot.slane %v1079_v61, 4 }
0x13f5   :  { %1090 = vrot.lane.b32.xlu1 %v1089_v62, %s3140_s20 }
0x1467   :  { %v1091_v63 = vpop.permute.xlu1 %1090 }
0x1468   :  { %2602 = vmatmul.mubr.msk.f32.vlgmr.msra.gmra.mrb[8].mxu0 %vm275_vm9, %v1091_v63 }
0x1469   :  { %2624 = vmatprep.mubr.msk.f32.mxu0 %vm3134_vm0, %v3135_v2 }
0x153b   :  { %v1160_v0 = vpop.f32.mrb[8].mxu0 }
0x153c   :  { %v1165_v4 = vrot.slane %v1160_v0, 2  ;;  %v2603_v6 = vpop.f32.mrb[9].mxu0 }
0x153e   :  { %v1167_v7 = vadd.f32 %v1165_v4, %v3399_v31  ;;  %v1177_v31 = vrot.slane %v1073_v58, 6 }
0x1540   :  { %v2413_v8 = vmul.f32 -1.442695, %v1167_v7 }
0x1542   :  { %2834 = vpow2.f32 %v2413_v8 }
0x1543   :  { %2836 = vtanh.f32 %v1167_v7 }
0x154c   :  { %v2835_v9 = vpop.eup %2834 }
0x154d   :  { %v1172_v11 = vadd.f32 1.0, %v2835_v9  ;;  %v2837_v13 = vpop.eup %2836 }
0x154f   :  { %2838 = vrcp.f32 %v1172_v11 }
0x1559   :  { %v2839_v14 = vpop.eup %2838 }
0x155a   :  { %v1175_v15 = vsel %vm3402_vm7, %v2837_v13, %v2839_v14 }
0x155b   :  { %1181 = vrot.lane.b32.xlu0 %v1175_v15, %s3137_s0  ;;  %v1179_v19 = vmul.f32 %v1177_v31, %v1175_v15 }
0x15cd   :  { %v1182_v17 = vpop.permute.xlu0 %1181 }
0x15ce   :  { %v1184_v18 = vmul.f32 %v1182_v17, %v1175_v15 }
0x15d0   :  { %1186 = vrot.lane.b32.xlu1 %v1184_v18, %s3138_s24 }
0x15d4   :  { %853 = vrot.lane.b32.xlu1 %v3483_v16, %s3141_s25 }
0x15d8   :  { %1085 = vrot.lane.b32.xlu1 %v1079_v61, %s3141_s25 }
0x15dc   :  { %385 = vrot.lane.b32.xlu1 %v3411_v46, %s3141_s25 }
0x15e0   :  { %619 = vrot.lane.b32.xlu1 %v3448_v32, %s3141_s25 }
0x15e4   :  { %497 = vrot.lane.b32.xlu1 %v3430_v5, %s3140_s20 }
0x15e8   :  { %731 = vrot.lane.b32.xlu1 %v3466_v54, %s3140_s20 }
0x15ec   :  { %1081 = vrot.lane.b32.xlu1 %v1079_v61, %s3140_s20 }
0x1642   :  { %v1187_v21 = vpop.permute.xlu1 %1186 }
0x1643   :  { %v1189_v16 = vadd.f32 %v1187_v21, %v1179_v19 }
0x1645   :  { %2840 = vtanh.f32 %v1189_v16 }
0x1646   :  { %v854_v22 = vpop.permute.xlu1 %853 }
0x1647   :  { %856 = vst.msk [vmem:[#allocation3 + $0x6] sm:$0x3] %vm383_vm8, %v854_v22 }
0x164a   :  { %v1086_v46 = vpop.permute.xlu1 %1085 }
0x164b   :  { %1088 = vst.msk [vmem:[#allocation3 - $0x2] sm:$0x30] %vm617_vm10, %v1086_v46 }
0x164e   :  { %v386_v23 = vpop.permute.xlu1 %385 }
0x164f   :  { %v2841_v24 = vpop.eup %2840  ;;  %388 = vst.msk [vmem:[#allocation3 + $0xe] sm:$0x3] %vm383_vm8, %v386_v23 }
0x1650   :  { %1192 = vrot.lane.b32.xlu0 %v2841_v24, %s3139_s2 }
0x1652   :  { %v620_v25 = vpop.permute.xlu1 %619 }
0x1653   :  { %622 = vst.msk [vmem:[#allocation3 + $0x6] sm:$0x30] %vm617_vm10, %v620_v25 }
0x1654   :  { %969 = vrot.lane.b32.xlu0 %v3502_v40, %s3141_s25 }
0x1656   :  { %v498_v10 = vpop.permute.xlu1 %497 }
0x1657   :  { %501 = vst.msk [vmem:[#allocation2] sm:$0xc] %vm500_vm11, %v498_v10 }
0x1658   :  { %502 = vrot.lane.b32.xlu0 %v3430_v5, %s3141_s25  ;;  %v1207_v5 = vld [vmem:[#allocation12] sm:$0xff] }
0x1659   :  { %v2726_v37 = vpack.c.bf16 %v1208_v34, %v1207_v5 }
0x165a   :  { %v732_v26 = vpop.permute.xlu1 %731 }
0x165b   :  { %735 = vst.msk [vmem:[#allocation2] sm:$0xc0] %vm734_vm12, %v732_v26  ;;  %2728 = vmatprep.subr.msk.bf16.mxu1 %vm3338_vm4, %v2726_v37 }
0x165c   :  { %736 = vrot.lane.b32.xlu0 %v3466_v54, %s3141_s25  ;;  %v1390_v54 = vld [vmem:[#allocation15] sm:$0xff] }
0x165d   :  { %v3555_v41 = vpack.c.bf16 %v1391_v39, %v1390_v54 }
0x165e   :  { %v1082_v27 = vpop.permute.xlu1 %1081 }
0x165f   :  { %1084 = vst.msk [vmem:[#allocation2 + $0x8] sm:$0x30] %vm617_vm10, %v1082_v27  ;;  %2734 = vmatpush3.bf16.msra.mxu0 %v3555_v41 }
0x1660   :  { %2622 = vmatprep.subr.mxu0 %v3135_v2 }
0x1663   :  { %2623 = vmatpush3.msk.msra.mxu0 %vm279_vm5, %v3563_v44 }
0x1664   :  { %2625 = vmatmul.mubr.f32.vlgmr.msra.gmra.mrb[10].mxu0 %v3135_v2  ;;  %2738 = vmatprep.subr.bf16.mxu0 %v3133_v1 }
0x1665   :  { %2740 = vmatpush3.bf16.msra.mxu0 %v3555_v41  ;;  %2642 = vmatprep.mubr.msk.f32.mxu0 %vm3134_vm0, %v3135_v2 }
0x1666   :  { %2640 = vmatprep.subr.mxu0 %v3135_v2 }
0x1669   :  { %2641 = vmatpush3.msk.msra.mxu0 %vm279_vm5, %v3563_v44 }
0x166a   :  { %2744 = vmatprep.subr.bf16.mxu0 %v3133_v1 }
0x16c2   :  { %v1193_v36 = vpop.permute.xlu0 %1192 }
0x16c3   :  { %v1195_v38 = vmul.f32 %v1193_v36, %v1175_v15 }
0x16c5   :  { %1201 = vrot.lane.b32.xlu0 %v1195_v38, %s3141_s25 }
0x16c6   :  { %v970_v42 = vpop.permute.xlu0 %969 }
0x16c7   :  { %972 = vst.msk [vmem:[#allocation3 + $0x2] sm:$0xc] %vm500_vm11, %v970_v42 }
0x16c9   :  { %614 = vrot.lane.b32.xlu0 %v3448_v32, %s3140_s20 }
0x16ca   :  { %v503_v43 = vpop.permute.xlu0 %502 }
0x16cb   :  { %505 = vst.msk [vmem:[#allocation3 + $0xa] sm:$0xc] %vm500_vm11, %v503_v43 }
0x16cd   :  { %965 = vrot.lane.b32.xlu0 %v3502_v40, %s3140_s20 }
0x16ce   :  { %v737_v45 = vpop.permute.xlu0 %736 }
0x16cf   :  { %739 = vst.msk [vmem:[#allocation3 + $0x2] sm:$0xc0] %vm734_vm12, %v737_v45 }
0x16d1   :  { %1197 = vrot.lane.b32.xlu0 %v1195_v38, %s3140_s20 }
0x16d6   :  { %v1210_v49 = vld [vmem:[#allocation3 + $0x8] sm:$0xff] }
0x1737   :  { %v1202_v32 = vpop.permute.xlu0 %1201  ;;  %v1466_v3 = vpop.f32.mrb[10].mxu0 }
0x1738   :  { %1204 = vst.msk [vmem:[#allocation3 - $0x6] sm:$0xc0] %vm734_vm12, %v1202_v32  ;;  %v2626_v52 = vpop.f32.mrb[11].mxu0 }
0x173b   :  { %v615_v40 = vpop.permute.xlu0 %614 }
0x173c   :  { %618 = vst.msk [vmem:[#allocation2] sm:$0x30] %vm617_vm10, %v615_v40 }
0x173f   :  { %v966_v47 = vpop.permute.xlu0 %965  ;;  %v1209_v48 = vld [vmem:[#allocation3] sm:$0xff] }
0x1740   :  { %968 = vst.msk [vmem:[#allocation2 + $0x8] sm:$0xc] %vm500_vm11, %v966_v47  ;;  %2608 = vmatprep.mubr.msk.f32.mxu1 %vm3796_vm13, %v1209_v48 }
0x1741   :  { %2609 = vmatmul.mubr.msk.f32.vlgmr.msra.gmra.mrb[8].mxu1 %vm3797_vm14, %v1210_v49 }
0x1742   :  { %2731 = vmatpush3.bf16.msk.msra.mxu1 %vm3338_vm4, %v2726_v37 }
0x1743   :  { %v1198_v50 = vpop.permute.xlu0 %1197  ;;  %v1205_v28 = vld [vmem:[#allocation2] sm:$0xff]  ;;  %2735 = vmatprep.subr.bf16.mxu1 %v3133_v1 }
0x1744   :  { %1200 = vst.msk [vmem:[#allocation2 + $0x8] sm:$0xc0] %vm734_vm12, %v1198_v50  ;;  %2615 = vmatprep.mubr.msk.f32.mxu1 %vm3798_vm15, %v1205_v28 }
0x174b   :  { %v1206_v51 = vld [vmem:[#allocation2 + $0x8] sm:$0xff] }
0x174c   :  { %2616 = vmatmul.mubr.msk.f32.vlgmr.msra.gmra.mrb[8].mxu1 %vm3799_vm1, %v1206_v51 }
0x174d   :  { %2737 = vmatpush3.bf16.msra.mxu1 %v3555_v41  ;;  %2633 = vmatprep.mubr.msk.f32.mxu1 %vm3134_vm0, %v3135_v2 }
0x174e   :  { %2631 = vmatprep.subr.mxu1 %v3135_v2 }
0x1751   :  { %2632 = vmatpush3.msk.msra.mxu1 %vm279_vm5, %v3563_v44 }
0x1752   :  { %2741 = vmatprep.subr.bf16.mxu1 %v3133_v1 }
0x181f   :  { %v2617_v55 = vpop.f32.mrb[8].mxu1 }
0x1820   :  { %v1389_v56 = vadd.f32 %v2617_v55, %v2420_v53  ;;  %v1372_v57 = vpop.f32.mrb[9].mxu1 }
0x1821   :  { %v1388_v30 = vadd.f32 %v2420_v53, %v1372_v57 }
0x1822   :  { %v1394_v58 = vrot.slane %v1389_v56, 6  ;;  %v1505_v59 = vrot.slane %v1389_v56, 2 }
0x1823   :  { %v1854_v60 = vrot.slane %v1388_v30, 6  ;;  %v1970_v61 = vrot.slane %v1388_v30, 2 }
0x1824   :  { %v3600_v62 = vsel %vm3380_vm2, %v1388_v30, %v1394_v58  ;;  %v3604_v63 = vsel %vm3380_vm2, %v1388_v30, %v1505_v59 }
0x1825   :  { %v1470_v0 = vadd.f32 %v1466_v3, %v3600_v62  ;;  %v3609_v4 = vsel %vm3380_vm2, %v1389_v56, %v1854_v60  ;;  %v3613_v6 = vsel %vm3380_vm2, %v1389_v56, %v1970_v61 }
0x1827   :  { %v2422_v7 = vmul.f32 -1.442695, %v1470_v0 }
0x1829   :  { %2842 = vpow2.f32 %v2422_v7 }
0x182a   :  { %2844 = vtanh.f32 %v1470_v0 }
0x1833   :  { %v2843_v8 = vpop.eup %2842 }
0x1834   :  { %v1475_v9 = vadd.f32 1.0, %v2843_v8  ;;  %v2845_v11 = vpop.eup %2844 }
0x1836   :  { %2846 = vrcp.f32 %v1475_v9 }
0x1840   :  { %v2847_v13 = vpop.eup %2846 }
0x1841   :  { %v1478_v14 = vsel %vm3402_vm7, %v2845_v11, %v2847_v13 }
0x1842   :  { %1481 = vrot.lane.b32.xlu1 %v1478_v14, %s3137_s0  ;;  %v1479_v20 = vmul.f32 0.0, %v1478_v14 }
0x18b4   :  { %v1482_v15 = vpop.permute.xlu1 %1481 }
0x18b5   :  { %v1484_v17 = vmul.f32 %v1482_v15, %v1478_v14 }
0x18b7   :  { %1486 = vrot.lane.b32.xlu0 %v1484_v17, %s3138_s24 }
0x1929   :  { %v1487_v18 = vpop.permute.xlu0 %1486 }
0x192a   :  { %v1489_v31 = vadd.f32 %v1487_v18, %v1479_v20 }
0x192c   :  { %2848 = vtanh.f32 %v1489_v31  ;;  %v1593_v36 = vrot.slane %v1489_v31, 6 }
0x1936   :  { %v2849_v19 = vpop.eup %2848 }
0x1937   :  { %1492 = vrot.lane.b32.xlu1 %v2849_v19, %s3139_s2 }
0x19a9   :  { %v1493_v21 = vpop.permute.xlu1 %1492 }
0x19aa   :  { %v3620_v16 = vmul.f32 %v1493_v21, %v1478_v14 }
0x19ac   :  { %1497 = vrot.lane.b32.xlu0 %v3620_v16, %s3140_s20 }
0x1a1e   :  { %v1498_v22 = vpop.permute.xlu0 %1497 }
0x1a1f   :  { %1500 = vst.msk [vmem:[#allocation4] sm:$0x3] %vm383_vm8, %v1498_v22  ;;  %2634 = vmatmul.mubr.msk.f32.vlgmr.msra.gmra.mrb[10].mxu1 %vm275_vm9, %v1498_v22 }
0x1a20   :  { %2743 = vmatpush3.bf16.msra.mxu1 %v3555_v41  ;;  %2651 = vmatprep.mubr.msk.f32.mxu1 %vm3134_vm0, %v3135_v2 }
0x1a21   :  { %2649 = vmatprep.subr.mxu1 %v3135_v2 }
0x1a24   :  { %2650 = vmatpush3.msk.msra.mxu1 %vm279_vm5, %v3563_v44 }
0x1a25   :  { %2747 = vmatprep.subr.bf16.mxu1 %v3133_v1 }
0x1af2   :  { %v1576_v46 = vpop.f32.mrb[10].mxu1 }
0x1af3   :  { %v1581_v23 = vrot.slane %v1576_v46, 6  ;;  %v2635_v24 = vpop.f32.mrb[11].mxu1 }
0x1af5   :  { %v1583_v25 = vadd.f32 %v1581_v23, %v3604_v63 }
0x1af7   :  { %v2425_v10 = vmul.f32 -1.442695, %v1583_v25 }
0x1af9   :  { %2850 = vpow2.f32 %v2425_v10 }
0x1afa   :  { %2852 = vtanh.f32 %v1583_v25 }
0x1b03   :  { %v2851_v26 = vpop.eup %2850 }
0x1b04   :  { %v1588_v27 = vadd.f32 1.0, %v2851_v26  ;;  %v2853_v12 = vpop.eup %2852 }
0x1b06   :  { %2854 = vrcp.f32 %v1588_v27 }
0x1b10   :  { %v2855_v29 = vpop.eup %2854 }
0x1b11   :  { %v1591_v33 = vsel %vm3402_vm7, %v2853_v12, %v2855_v29 }
0x1b12   :  { %1597 = vrot.lane.b32.xlu1 %v1591_v33, %s3137_s0  ;;  %v1595_v37 = vmul.f32 %v1593_v36, %v1591_v33 }
0x1b84   :  { %v1598_v5 = vpop.permute.xlu1 %1597 }
0x1b85   :  { %v1600_v34 = vmul.f32 %v1598_v5, %v1591_v33 }
0x1b87   :  { %1602 = vrot.lane.b32.xlu0 %v1600_v34, %s3138_s24 }
0x1bf9   :  { %v1603_v38 = vpop.permute.xlu0 %1602 }
0x1bfa   :  { %v1605_v54 = vadd.f32 %v1603_v38, %v1595_v37 }
0x1bfc   :  { %2856 = vtanh.f32 %v1605_v54  ;;  %v1709_v57 = vrot.slane %v1605_v54, 6 }
0x1c06   :  { %v2857_v39 = vpop.eup %2856 }
0x1c07   :  { %1608 = vrot.lane.b32.xlu1 %v2857_v39, %s3139_s2 }
0x1c79   :  { %v1609_v42 = vpop.permute.xlu1 %1608 }
0x1c7a   :  { %v3639_v43 = vmul.f32 %v1609_v42, %v1591_v33 }
0x1c7c   :  { %v1621_v45 = vrot.slane %v3639_v43, 2 }
0x1c7e   :  { %1622 = vrot.lane.b32.xlu0 %v1621_v45, %s3140_s20 }
0x1cf0   :  { %v1623_v32 = vpop.permute.xlu0 %1622 }
0x1cf1   :  { %2643 = vmatmul.mubr.msk.f32.vlgmr.msra.gmra.mrb[12].mxu0 %vm275_vm9, %v1623_v32 }
0x1cf2   :  { %2746 = vmatpush3.bf16.msra.mxu0 %v3555_v41  ;;  %2660 = vmatprep.mubr.msk.f32.mxu0 %vm3134_vm0, %v3135_v2 }
0x1cf3   :  { %2658 = vmatprep.subr.mxu0 %v3135_v2 }
0x1cf6   :  { %2659 = vmatpush3.msk.msra.mxu0 %vm279_vm5, %v3563_v44 }
0x1cf7   :  { %2750 = vmatprep.subr.bf16.mxu0 %v3133_v1 }
0x1dc4   :  { %v1692_v40 = vpop.f32.mrb[12].mxu0 }
0x1dc5   :  { %v1697_v47 = vrot.slane %v1692_v40, 4  ;;  %v2644_v48 = vpop.f32.mrb[13].mxu0 }
0x1dc7   :  { %v1699_v49 = vadd.f32 %v1697_v47, %v3600_v62 }
0x1dc9   :  { %v2428_v50 = vmul.f32 -1.442695, %v1699_v49 }
0x1dcb   :  { %2858 = vpow2.f32 %v2428_v50 }
0x1dcc   :  { %2860 = vtanh.f32 %v1699_v49 }
0x1dd5   :  { %v2859_v28 = vpop.eup %2858 }
0x1dd6   :  { %v1704_v51 = vadd.f32 1.0, %v2859_v28  ;;  %v2861_v3 = vpop.eup %2860 }
0x1dd8   :  { %2862 = vrcp.f32 %v1704_v51 }
0x1de2   :  { %v2863_v52 = vpop.eup %2862 }
0x1de3   :  { %v1707_v53 = vsel %vm3402_vm7, %v2861_v3, %v2863_v52 }
0x1de4   :  { %1713 = vrot.lane.b32.xlu1 %v1707_v53, %s3137_s0  ;;  %v1711_v30 = vmul.f32 %v1709_v57, %v1707_v53 }
0x1e56   :  { %v1714_v55 = vpop.permute.xlu1 %1713 }
0x1e57   :  { %v1716_v56 = vmul.f32 %v1714_v55, %v1707_v53 }
0x1e59   :  { %1718 = vrot.lane.b32.xlu0 %v1716_v56, %s3138_s24 }
0x1ecb   :  { %v1719_v58 = vpop.permute.xlu0 %1718 }
0x1ecc   :  { %v1721_v59 = vadd.f32 %v1719_v58, %v1711_v30 }
0x1ece   :  { %2864 = vtanh.f32 %v1721_v59  ;;  %v1825_v21 = vrot.slane %v1721_v59, 6 }
0x1ed8   :  { %v2865_v60 = vpop.eup %2864 }
0x1ed9   :  { %1724 = vrot.lane.b32.xlu1 %v2865_v60, %s3139_s2 }
0x1f4b   :  { %v1725_v61 = vpop.permute.xlu1 %1724 }
0x1f4c   :  { %v3657_v62 = vmul.f32 %v1725_v61, %v1707_v53 }
0x1f4e   :  { %v1737_v0 = vrot.slane %v3657_v62, 4 }
0x1f50   :  { %1738 = vrot.lane.b32.xlu0 %v1737_v0, %s3140_s20 }
0x1fc2   :  { %v1739_v7 = vpop.permute.xlu0 %1738 }
0x1fc3   :  { %2652 = vmatmul.mubr.msk.f32.vlgmr.msra.gmra.mrb[12].mxu1 %vm275_vm9, %v1739_v7 }
0x1fc4   :  { %2749 = vmatpush3.bf16.msra.mxu1 %v3555_v41  ;;  %2669 = vmatprep.mubr.msk.f32.mxu1 %vm3134_vm0, %v3135_v2 }
0x1fc5   :  { %2667 = vmatprep.subr.mxu1 %v3135_v2 }
0x1fc8   :  { %2668 = vmatpush3.msk.msra.mxu1 %vm279_vm5, %v3563_v44 }
0x1fc9   :  { %2753 = vmatprep.subr.bf16.mxu1 %v3133_v1 }
0x2096   :  { %v1808_v8 = vpop.f32.mrb[12].mxu1 }
0x2097   :  { %v1813_v9 = vrot.slane %v1808_v8, 2  ;;  %v2653_v11 = vpop.f32.mrb[13].mxu1 }
0x2099   :  { %v1815_v13 = vadd.f32 %v1813_v9, %v3604_v63 }
0x209b   :  { %v2431_v14 = vmul.f32 -1.442695, %v1815_v13 }
0x209d   :  { %2866 = vpow2.f32 %v2431_v14 }
0x209e   :  { %2868 = vtanh.f32 %v1815_v13 }
0x20a7   :  { %v2867_v15 = vpop.eup %2866 }
0x20a8   :  { %v1820_v17 = vadd.f32 1.0, %v2867_v15  ;;  %v2869_v20 = vpop.eup %2868 }
0x20aa   :  { %2870 = vrcp.f32 %v1820_v17 }
0x20b4   :  { %v2871_v18 = vpop.eup %2870 }
0x20b5   :  { %v1823_v31 = vsel %vm3402_vm7, %v2869_v20, %v2871_v18 }
0x20b6   :  { %1829 = vrot.lane.b32.xlu1 %v1823_v31, %s3137_s0  ;;  %v1827_v22 = vmul.f32 %v1825_v21, %v1823_v31 }
0x2128   :  { %v1830_v19 = vpop.permute.xlu1 %1829 }
0x2129   :  { %v1832_v1 = vmul.f32 %v1830_v19, %v1823_v31 }
0x212b   :  { %1834 = vrot.lane.b32.xlu0 %v1832_v1, %s3138_s24 }
0x219d   :  { %v1835_v63 = vpop.permute.xlu0 %1834 }
0x219e   :  { %v1837_v46 = vadd.f32 %v1835_v63, %v1827_v22 }
0x21a0   :  { %2872 = vtanh.f32 %v1837_v46  ;;  %v1942_v42 = vrot.slane %v1837_v46, 6 }
0x21aa   :  { %v2873_v23 = vpop.eup %2872 }
0x21ab   :  { %1840 = vrot.lane.b32.xlu1 %v2873_v23, %s3139_s2 }
0x221d   :  { %v1841_v24 = vpop.permute.xlu1 %1840 }
0x221e   :  { %v3675_v25 = vmul.f32 %v1841_v24, %v1823_v31 }
0x2220   :  { %v1857_v10 = vrot.slane %v3675_v25, 6 }
0x2222   :  { %1858 = vrot.lane.b32.xlu0 %v1857_v10, %s3140_s20 }
0x2294   :  { %v1859_v26 = vpop.permute.xlu0 %1858 }
0x2295   :  { %2661 = vmatmul.mubr.msk.f32.vlgmr.msra.gmra.mrb[14].mxu0 %vm275_vm9, %v1859_v26 }
0x2296   :  { %2752 = vmatpush3.bf16.msra.mxu0 %v3555_v41  ;;  %2678 = vmatprep.mubr.msk.f32.mxu0 %vm3134_vm0, %v3135_v2 }
0x2297   :  { %2676 = vmatprep.subr.mxu0 %v3135_v2 }
0x229a   :  { %2677 = vmatpush3.msk.msra.mxu0 %vm279_vm5, %v3563_v44 }
0x2368   :  { %v1928_v27 = vpop.f32.mrb[14].mxu0 }
0x2369   :  { %v1932_v12 = vadd.f32 %v1928_v27, %v3609_v4  ;;  %v2662_v29 = vpop.f32.mrb[15].mxu0 }
0x236b   :  { %v2434_v33 = vmul.f32 -1.442695, %v1932_v12 }
0x236d   :  { %2874 = vpow2.f32 %v2434_v33 }
0x236e   :  { %2876 = vtanh.f32 %v1932_v12 }
0x2377   :  { %v2875_v5 = vpop.eup %2874 }
0x2378   :  { %v1937_v34 = vadd.f32 1.0, %v2875_v5  ;;  %v2877_v36 = vpop.eup %2876 }
0x237a   :  { %2878 = vrcp.f32 %v1937_v34 }
0x2384   :  { %v2879_v37 = vpop.eup %2878 }
0x2385   :  { %v1940_v38 = vsel %vm3402_vm7, %v2877_v36, %v2879_v37 }
0x2386   :  { %1946 = vrot.lane.b32.xlu1 %v1940_v38, %s3137_s0  ;;  %v1944_v45 = vmul.f32 %v1942_v42, %v1940_v38 }
0x23f8   :  { %v1947_v54 = vpop.permute.xlu1 %1946 }
0x23f9   :  { %v1949_v39 = vmul.f32 %v1947_v54, %v1940_v38 }
0x23fb   :  { %1951 = vrot.lane.b32.xlu0 %v1949_v39, %s3138_s24 }
0x246d   :  { %v1952_v32 = vpop.permute.xlu0 %1951 }
0x246e   :  { %v1954_v40 = vadd.f32 %v1952_v32, %v1944_v45 }
0x2470   :  { %2880 = vtanh.f32 %v1954_v40  ;;  %v2058_v58 = vrot.slane %v1954_v40, 6 }
0x247a   :  { %v2881_v47 = vpop.eup %2880 }
0x247b   :  { %1957 = vrot.lane.b32.xlu1 %v2881_v47, %s3139_s2 }
0x24ed   :  { %v1958_v48 = vpop.permute.xlu1 %1957 }
0x24ee   :  { %v3692_v49 = vmul.f32 %v1958_v48, %v1940_v38 }
0x24f0   :  { %1962 = vrot.lane.b32.xlu0 %v3692_v49, %s3140_s20 }
0x2562   :  { %v1963_v50 = vpop.permute.xlu0 %1962 }
0x2563   :  { %1965 = vst.msk [vmem:[#allocation4 + $0x8] sm:$0x3] %vm383_vm8, %v1963_v50  ;;  %2670 = vmatmul.mubr.msk.f32.vlgmr.msra.gmra.mrb[14].mxu1 %vm275_vm9, %v1963_v50 }
0x2564   :  { %2755 = vmatpush3.bf16.msra.mxu1 %v3555_v41  ;;  %2687 = vmatprep.mubr.msk.f32.mxu1 %vm3134_vm0, %v3135_v2  ;;  %vm3800_vm0 = vmmov %vm3799_vm1 }
0x2565   :  { %2685 = vmatprep.subr.mxu1 %v3135_v2  ;;  %vm3801_vm2 = vmmov %vm3800_vm0 }
0x2566   :  { %vm3802_vm4 = vmmov %vm3800_vm0 }
0x2568   :  { %2686 = vmatpush3.msk.msra.mxu1 %vm279_vm5, %v3563_v44  ;;  %vm3803_vm5 = vmmov %vm3800_vm0 }
0x2636   :  { %v2041_v28 = vpop.f32.mrb[14].mxu1 }
0x2637   :  { %v2046_v51 = vrot.slane %v2041_v28, 6  ;;  %v2671_v3 = vpop.f32.mrb[15].mxu1 }
0x2639   :  { %v2048_v52 = vadd.f32 %v2046_v51, %v3613_v6 }
0x263b   :  { %v2437_v53 = vmul.f32 -1.442695, %v2048_v52 }
0x263d   :  { %2882 = vpow2.f32 %v2437_v53 }
0x263e   :  { %2884 = vtanh.f32 %v2048_v52 }
0x2647   :  { %v2883_v55 = vpop.eup %2882 }
0x2648   :  { %v2053_v56 = vadd.f32 1.0, %v2883_v55  ;;  %v2885_v41 = vpop.eup %2884 }
0x264a   :  { %2886 = vrcp.f32 %v2053_v56 }
0x2654   :  { %v2887_v57 = vpop.eup %2886 }
0x2655   :  { %v2056_v30 = vsel %vm3402_vm7, %v2885_v41, %v2887_v57 }
0x2656   :  { %2062 = vrot.lane.b32.xlu1 %v2056_v30, %s3137_s0  ;;  %v2060_v59 = vmul.f32 %v2058_v58, %v2056_v30 }
0x26c8   :  { %v2063_v2 = vpop.permute.xlu1 %2062 }
0x26c9   :  { %v2065_v44 = vmul.f32 %v2063_v2, %v2056_v30  ;;  %v2444_v2 = vld [vmem:[#allocation18] ss:$0 sm:$0xff] }
0x26cb   :  { %2067 = vrot.lane.b32.xlu0 %v2065_v44, %s3138_s24 }
0x273d   :  { %v2068_v60 = vpop.permute.xlu0 %2067 }
0x273e   :  { %v2070_v61 = vadd.f32 %v2068_v60, %v2060_v59 }
0x2740   :  { %2888 = vtanh.f32 %v2070_v61  ;;  %v2174_v46 = vrot.slane %v2070_v61, 6  ;;  %v2445_v61 = vld [vmem:[#allocation20] ss:$0 sm:$0xff] }
0x274a   :  { %v2889_v0 = vpop.eup %2888 }
0x274b   :  { %2073 = vrot.lane.b32.xlu1 %v2889_v0, %s3139_s2 }
0x27bd   :  { %v2074_v7 = vpop.permute.xlu1 %2073 }
0x27be   :  { %v3710_v8 = vmul.f32 %v2074_v7, %v2056_v30 }
0x27c0   :  { %v2086_v9 = vrot.slane %v3710_v8, 2 }
0x27c2   :  { %2087 = vrot.lane.b32.xlu0 %v2086_v9, %s3140_s20 }
0x2834   :  { %v2088_v11 = vpop.permute.xlu0 %2087 }
0x2835   :  { %2679 = vmatmul.mubr.msk.f32.vlgmr.msra.gmra.mrb[16].mxu0 %vm275_vm9, %v2088_v11 }
0x2908   :  { %v2157_v13 = vpop.f32.mrb[16].mxu0 }
0x2909   :  { %v2162_v14 = vrot.slane %v2157_v13, 4  ;;  %v2680_v15 = vpop.f32.mrb[17].mxu0 }
0x290b   :  { %v2164_v17 = vadd.f32 %v2162_v14, %v3609_v4 }
0x290d   :  { %v2440_v20 = vmul.f32 -1.442695, %v2164_v17 }
0x290f   :  { %2890 = vpow2.f32 %v2440_v20 }
0x2910   :  { %2892 = vtanh.f32 %v2164_v17 }
0x2919   :  { %v2891_v18 = vpop.eup %2890 }
0x291a   :  { %v2169_v31 = vadd.f32 1.0, %v2891_v18  ;;  %v2893_v19 = vpop.eup %2892  ;;  %v2446_v18 = vld [vmem:[#allocation6] ss:$0 sm:$0xff] }
0x291c   :  { %2894 = vrcp.f32 %v2169_v31 }
0x2926   :  { %v2895_v1 = vpop.eup %2894 }
0x2927   :  { %v2172_v21 = vsel %vm3402_vm7, %v2893_v19, %v2895_v1 }
0x2928   :  { %2178 = vrot.lane.b32.xlu1 %v2172_v21, %s3137_s0  ;;  %v2176_v23 = vmul.f32 %v2174_v46, %v2172_v21 }
0x299a   :  { %v2179_v22 = vpop.permute.xlu1 %2178 }
0x299b   :  { %v2181_v63 = vmul.f32 %v2179_v22, %v2172_v21 }
0x299d   :  { %2183 = vrot.lane.b32.xlu0 %v2181_v63, %s3138_s24 }
0x2a0f   :  { %v2184_v4 = vpop.permute.xlu0 %2183 }
0x2a10   :  { %v2186_v24 = vadd.f32 %v2184_v4, %v2176_v23 }
0x2a12   :  { %2896 = vtanh.f32 %v2186_v24  ;;  %v2290_v35 = vrot.slane %v2186_v24, 6 }
0x2a1c   :  { %v2897_v10 = vpop.eup %2896 }
0x2a1d   :  { %2189 = vrot.lane.b32.xlu1 %v2897_v10, %s3139_s2 }
0x2a8f   :  { %v2190_v26 = vpop.permute.xlu1 %2189 }
0x2a90   :  { %v2192_v27 = vmul.f32 %v2190_v26, %v2172_v21 }
0x2a92   :  { %v2202_v12 = vrot.slane %v2192_v27, 4 }
0x2a94   :  { %2203 = vrot.lane.b32.xlu0 %v2202_v12, %s3140_s20 }
0x2b06   :  { %v2204_v29 = vpop.permute.xlu0 %2203 }
0x2b07   :  { %2688 = vmatmul.mubr.msk.f32.vlgmr.msra.gmra.mrb[16].mxu1 %vm275_vm9, %v2204_v29 }
0x2bda   :  { %v2273_v33 = vpop.f32.mrb[16].mxu1 }
0x2bdb   :  { %v2278_v5 = vrot.slane %v2273_v33, 2  ;;  %v2689_v34 = vpop.f32.mrb[17].mxu1 }
0x2bdd   :  { %v2280_v36 = vadd.f32 %v2278_v5, %v3613_v6 }
0x2bdf   :  { %v2443_v37 = vmul.f32 -1.442695, %v2280_v36 }
0x2be1   :  { %2898 = vpow2.f32 %v2443_v37 }
0x2be2   :  { %2900 = vtanh.f32 %v2280_v36 }
0x2beb   :  { %v2899_v38 = vpop.eup %2898 }
0x2bec   :  { %v2285_v54 = vadd.f32 1.0, %v2899_v38  ;;  %v2901_v39 = vpop.eup %2900 }
0x2bee   :  { %2902 = vrcp.f32 %v2285_v54 }
0x2bf8   :  { %v2903_v42 = vpop.eup %2902 }
0x2bf9   :  { %v2288_v45 = vsel %vm3402_vm7, %v2901_v39, %v2903_v42 }
0x2bfa   :  { %2294 = vrot.lane.b32.xlu1 %v2288_v45, %s3137_s0  ;;  %v2292_v6 = vmul.f32 %v2290_v35, %v2288_v45 }
0x2c6c   :  { %v2295_v32 = vpop.permute.xlu1 %2294 }
0x2c6d   :  { %v2297_v40 = vmul.f32 %v2295_v32, %v2288_v45 }
0x2c6f   :  { %2299 = vrot.lane.b32.xlu0 %v2297_v40, %s3138_s24 }
0x2c73   :  { %1501 = vrot.lane.b32.xlu0 %v3620_v16, %s3141_s25 }
0x2c77   :  { %1617 = vrot.lane.b32.xlu0 %v3639_v43, %s3141_s25 }
0x2c7b   :  { %1733 = vrot.lane.b32.xlu0 %v3657_v62, %s3141_s25 }
0x2c7f   :  { %1849 = vrot.lane.b32.xlu0 %v3675_v25, %s3141_s25 }
0x2c83   :  { %2078 = vrot.lane.b32.xlu0 %v3710_v8, %s3140_s20 }
0x2c87   :  { %2194 = vrot.lane.b32.xlu0 %v2192_v27, %s3140_s20 }
0x2ce1   :  { %v2300_v47 = vpop.permute.xlu0 %2299 }
0x2ce2   :  { %v2302_v48 = vadd.f32 %v2300_v47, %v2292_v6 }
0x2ce4   :  { %2904 = vtanh.f32 %v2302_v48 }
0x2ce5   :  { %v1502_v16 = vpop.permute.xlu0 %1501 }
0x2ce6   :  { %1504 = vst.msk [vmem:[#allocation5 + $0xe] sm:$0x3] %vm383_vm8, %v1502_v16 }
0x2ce9   :  { %v1618_v50 = vpop.permute.xlu0 %1617 }
0x2cea   :  { %1620 = vst.msk [vmem:[#allocation5 + $0xa] sm:$0xc] %vm500_vm11, %v1618_v50 }
0x2ced   :  { %v1734_v28 = vpop.permute.xlu0 %1733 }
0x2cee   :  { %v2905_v51 = vpop.eup %2904  ;;  %1736 = vst.msk [vmem:[#allocation5 + $0x6] sm:$0x30] %vm617_vm10, %v1734_v28 }
0x2cef   :  { %2305 = vrot.lane.b32.xlu1 %v2905_v51, %s3139_s2 }
0x2cf1   :  { %v1850_v3 = vpop.permute.xlu0 %1849 }
0x2cf2   :  { %1852 = vst.msk [vmem:[#allocation5 + $0x2] sm:$0xc0] %vm734_vm12, %v1850_v3 }
0x2cf3   :  { %1613 = vrot.lane.b32.xlu1 %v3639_v43, %s3140_s20 }
0x2cf5   :  { %v2079_v52 = vpop.permute.xlu0 %2078 }
0x2cf6   :  { %2081 = vst.msk [vmem:[#allocation4 + $0x8] sm:$0xc] %vm500_vm11, %v2079_v52 }
0x2cf7   :  { %1729 = vrot.lane.b32.xlu1 %v3657_v62, %s3140_s20 }
0x2cf9   :  { %v2195_v53 = vpop.permute.xlu0 %2194 }
0x2cfa   :  { %2197 = vst.msk [vmem:[#allocation4 + $0x8] sm:$0x30] %vm617_vm10, %v2195_v53 }
0x2cfb   :  { %1845 = vrot.lane.b32.xlu1 %v3675_v25, %s3140_s20 }
0x2cff   :  { %1966 = vrot.lane.b32.xlu1 %v3692_v49, %s3141_s25 }
0x2d03   :  { %2082 = vrot.lane.b32.xlu1 %v3710_v8, %s3141_s25  ;;  %v2336_v8 = vld [vmem:[#allocation5 + $0x8] sm:$0xff] }
0x2d04   :  { %v2345_v15 = vmul.f32 %v2445_v61, %v2336_v8 }
0x2d06   :  { %v2349_v17 = vsel %vm3803_vm5, %v2345_v15, 0.0 }
0x2d07   :  { %2198 = vrot.lane.b32.xlu1 %v2192_v27, %s3141_s25 }
0x2d61   :  { %v2306_v43 = vpop.permute.xlu1 %2305 }
0x2d62   :  { %v2308_v55 = vmul.f32 %v2306_v43, %v2288_v45 }
0x2d64   :  { %2314 = vrot.lane.b32.xlu1 %v2308_v55, %s3141_s25  ;;  %2310 = vrot.lane.b32.xlu0 %v2308_v55, %s3140_s20 }
0x2d65   :  { %v1614_v62 = vpop.permute.xlu1 %1613 }
0x2d66   :  { %1616 = vst.msk [vmem:[#allocation4] sm:$0xc] %vm500_vm11, %v1614_v62 }
0x2d69   :  { %v1730_v56 = vpop.permute.xlu1 %1729 }
0x2d6a   :  { %1732 = vst.msk [vmem:[#allocation4] sm:$0x30] %vm617_vm10, %v1730_v56 }
0x2d6d   :  { %v1846_v25 = vpop.permute.xlu1 %1845 }
0x2d6e   :  { %1848 = vst.msk [vmem:[#allocation4] sm:$0xc0] %vm734_vm12, %v1846_v25 }
0x2d71   :  { %v1967_v49 = vpop.permute.xlu1 %1966 }
0x2d72   :  { %1969 = vst.msk [vmem:[#allocation5 + $0x6] sm:$0x3] %vm383_vm8, %v1967_v49 }
0x2d75   :  { %v2083_v41 = vpop.permute.xlu1 %2082  ;;  %v2318_v30 = vld [vmem:[#allocation4] sm:$0xff] }
0x2d76   :  { %2085 = vst.msk [vmem:[#allocation5 + $0x2] sm:$0xc] %vm500_vm11, %v2083_v41  ;;  %v2327_v44 = vmul.f32 %v2444_v2, %v2318_v30 }
0x2d78   :  { %v2329_v58 = vsel %vm3800_vm0, %v2327_v44, 0.0 }
0x2d79   :  { %v2199_v57 = vpop.permute.xlu1 %2198 }
0x2d7a   :  { %2201 = vst.msk [vmem:[#allocation5 - $0x2] sm:$0x30] %vm617_vm10, %v2199_v57 }
0x2d83   :  { %2330 = vadd.xlane.f32.xlu0 %v2329_v58 }
0x2dd6   :  { %v2311_v59 = vpop.permute.xlu0 %2310  ;;  %v2315_v60 = vpop.permute.xlu1 %2314 }
0x2dd7   :  { %2313 = vst.msk [vmem:[#allocation4 + $0x8] sm:$0xc0] %vm734_vm12, %v2311_v59  ;;  %2317 = vst.msk [vmem:[#allocation5 - $0x6] sm:$0xc0] %vm734_vm12, %v2315_v60 }
0x2dde   :  { %v2319_v0 = vld [vmem:[#allocation4 + $0x8] sm:$0xff]  ;;  %v2335_v7 = vld [vmem:[#allocation5] sm:$0xff] }
0x2ddf   :  { %v2328_v9 = vmul.f32 %v2444_v2, %v2319_v0  ;;  %v2344_v11 = vmul.f32 %v2445_v61, %v2335_v7 }
0x2de1   :  { %v2332_v13 = vsel %vm3801_vm2, %v2328_v9, 0.0  ;;  %v2346_v14 = vsel %vm3802_vm4, %v2344_v11, 0.0 }
0x2de2   :  { %2333 = vadd.xlane.f32.xlu1 %v2332_v13  ;;  %2347 = vadd.xlane.f32.xlu0 %v2346_v14 }
0x2de6   :  { %2350 = vadd.xlane.f32.xlu0 %v2349_v17 }
0x2e10   :  { %v2331_v20 = vpop.xlane.xlu0 %2330 }
0x2e6f   :  { %v2348_v31 = vpop.xlane.xlu0 %2347  ;;  %v2334_v21 = vpop.xlane.xlu1 %2333 }
0x2e70   :  { %v2352_v19 = vadd.f32 %v2348_v31, %v2331_v20 }
0x2e72   :  { %v2361_v1 = vadd.f32 %v2446_v18, %v2352_v19 }
0x2e73   :  { %v2351_v22 = vpop.xlane.xlu0 %2350 }
0x2e74   :  { %v2447_v63 = vmul.f32 -1.442695, %v2361_v1  ;;  %v2353_v46 = vadd.f32 %v2351_v22, %v2334_v21 }
0x2e76   :  { %2906 = vpow2.f32 %v2447_v63  ;;  %v2362_v23 = vadd.f32 %v2446_v18, %v2353_v46 }
0x2e78   :  { %v2448_v4 = vmul.f32 -1.442695, %v2362_v23 }
0x2e7a   :  { %2908 = vpow2.f32 %v2448_v4 }
0x2e80   :  { %v2907_v24 = vpop.eup %2906 }
0x2e81   :  { %v2369_v10 = vadd.f32 1.0, %v2907_v24 }
0x2e83   :  { %2910 = vrcp.f32 %v2369_v10 }
0x2e84   :  { %v2909_v26 = vpop.eup %2908 }
0x2e85   :  { %v2370_v27 = vadd.f32 1.0, %v2909_v26 }
0x2e87   :  { %2912 = vrcp.f32 %v2370_v27 }
0x2e8d   :  { %v2911_v12 = vpop.eup %2910 }
0x2e8e   :  { %2376 = vst.msk [vmem:[%s3788_s11] sm:$0xff] %vm2375_vm3, %v2911_v12 }
0x2e91   :  { %v2913_v29 = vpop.eup %2912 }
0x2e92   :  { %2377 = vst.msk [vmem:[%s3788_s11 + $0x8] sm:$0xff] %vm2375_vm3, %v2913_v29 }
0x2e93   :  { %2382 = vsyncpa [#allocation8], 1 }
0x2e94   :  { %2383 = vsyncpa [#allocation10], 1 }
0x2e95   :  { %2384 = vsyncpa [#allocation13], 1 }
0x2e96   :  { %2385 = vsyncpa [#allocation16], 1 }
0x2e97   :  { %2386 = vsyncpa [#allocation19], 1 }

</bundles_post_ra>
